<compile_context>
chip_gen: v5e
topology: v5e:2x2
jax: 0.10.0
libtpu: 0.0.40
codegen_flags: <defaults>
</compile_context>

<pallas_src>
import functools

import jax
import jax.numpy as jnp
from jax import lax
from jax.experimental import pallas as pl
from jax.experimental.pallas import tpu as pltpu


SP_COLS = 23  # packed spatial params per channel: k1[0:9], k2[9:18], bn_s, bn_b, b1, b2, ls


# --------------------------------------------------------------------------------------
# Pallas kernels
# --------------------------------------------------------------------------------------

def _depthwise3x3(cells, taps, bias, masks, W, M):
    """Depthwise 3x3 conv (zero pad=1) on a flattened (C, M=H*W) grid.

    cells: (C, M); taps: (C, 9); bias: (C, 1); masks: (9, 1, M) 0/1 boundary-validity.
    Implemented with lane rolls + masks instead of (M, M) shift matmuls.
    """
    acc = jnp.zeros_like(cells)
    tap = 0
    for di in (-1, 0, 1):
        for dj in (-1, 0, 1):
            off = di * W + dj                       # flattened neighbour offset
            if off == 0:
                shifted = cells
            else:
                shifted = pltpu.roll(cells, shift=(-off) % M, axis=1) * masks[tap]
            acc = acc + shifted * taps[:, tap:tap + 1]
            tap += 1
    return acc + bias


def channel_mix_kernel(x_ref, valid_ref, w1_ref, w2_ref, vec_ref,
                       o_ref, mom_ref, ms_ref, mss_ref):
    """y = x + LayerScale(W2 relu(W1' x + b1') + b2); BN pre-folded into W1'/b1'.

    BN moments of y are accumulated in VMEM scratch and emitted once per batch.
    """
    n = pl.program_id(1)

    @pl.when(n == 0)
    def _init():
        ms_ref[...] = jnp.zeros_like(ms_ref)
        mss_ref[...] = jnp.zeros_like(mss_ref)

    x = x_ref[0]                                    # (C, TN)
    v = vec_ref[...]                                # (C, 3) = [b1', b2, ls]
    h = jnp.dot(w1_ref[...], x, preferred_element_type=jnp.float32) + v[:, 0:1]
    h = jnp.maximum(h, 0.0)
    y = jnp.dot(w2_ref[...], h, preferred_element_type=jnp.float32) + v[:, 1:2]
    y = (x + y * v[:, 2:3]) * valid_ref[0]          # pad points forced to exactly 0
    o_ref[0] = y.astype(o_ref.dtype)

    ms_ref[...] = ms_ref[...] + jnp.sum(y, axis=1, keepdims=True)
    mss_ref[...] = mss_ref[...] + jnp.sum(y * y, axis=1, keepdims=True)

    @pl.when(n == pl.num_programs(1) - 1)
    def _emit():
        mom_ref[0] = jnp.concatenate([ms_ref[...], mss_ref[...]], axis=1)


def spatial_flatten_kernel(x_ref, ci_ref, wgt_ref, par_ref, u_ref):
    """cells += BN(x_tile) @ flatten^T_tile; flatten^T built in-kernel from cell indices."""
    n = pl.program_id(1)
    M = u_ref.shape[-1]

    @pl.when(n == 0)
    def _init():
        u_ref[0] = jnp.zeros(u_ref.shape[1:], u_ref.dtype)

    p = par_ref[...]
    bn_s, bn_b = p[:, 18:19], p[:, 19:20]
    xh = x_ref[0] * bn_s + bn_b                     # (C, TN)
    ci = ci_ref[0]                                  # (TN, 1) int32 cell index per point
    w = wgt_ref[0]                                  # (TN, 1) f32   flatten weight per point
    sel = ci == lax.broadcasted_iota(jnp.int32, (ci.shape[0], M), 1)
    flatT = jnp.where(sel, w, 0.0)                  # (TN, M) per-tile flatten^T (0 on pads)
    u_ref[0] = u_ref[0] + jnp.dot(xh, flatT, preferred_element_type=jnp.float32)


def spatial_ffn_kernel(u_ref, mask_ref, par_ref, v_ref, *, H, W):
    """Depthwise Conv3x3 -> ReLU -> Conv3x3 on the (C, M) cell grid (per batch)."""
    p = par_ref[...]
    mk = mask_ref[...]                              # (9, 1, M)
    cells = u_ref[0]                                # (C, M)
    t = _depthwise3x3(cells, p[:, 0:9], p[:, 20:21], mk, W, H * W)
    t = jnp.maximum(t, 0.0)
    v_ref[0] = _depthwise3x3(t, p[:, 9:18], p[:, 21:22], mk, W, H * W)


def spatial_inflate_kernel(x_ref, v_ref, ci_ref, occ_ref, valid_ref, par_ref,
                           o_ref, mom_ref, ms_ref, mss_ref):
    """y = x + LayerScale(Inflate(v)); inflate^T built in-kernel; fused BN moments of y."""
    n = pl.program_id(1)
    M = v_ref.shape[-1]

    @pl.when(n == 0)
    def _init():
        ms_ref[...] = jnp.zeros_like(ms_ref)
        mss_ref[...] = jnp.zeros_like(mss_ref)

    ls = par_ref[:, 22:23]                          # (C, 1)
    ci = ci_ref[0]                                  # (1, TN) int32
    occ = occ_ref[0]                                # (1, TN) f32
    sel = ci == lax.broadcasted_iota(jnp.int32, (M, ci.shape[-1]), 0)
    inflT = jnp.where(sel, occ, 0.0)                # (M, TN) per-tile inflate^T
    pts = jnp.dot(v_ref[0], inflT, preferred_element_type=jnp.float32)   # (C, TN)
    y = (x_ref[0] + pts * ls) * valid_ref[0]
    o_ref[0] = y.astype(o_ref.dtype)

    ms_ref[...] = ms_ref[...] + jnp.sum(y, axis=1, keepdims=True)
    mss_ref[...] = mss_ref[...] + jnp.sum(y * y, axis=1, keepdims=True)

    @pl.when(n == pl.num_programs(1) - 1)
    def _emit():
        mom_ref[0] = jnp.concatenate([ms_ref[...], mss_ref[...]], axis=1)


# --------------------------------------------------------------------------------------
# Pallas wrappers
# --------------------------------------------------------------------------------------

def _round_up(x, m):
    return ((x + m - 1) // m) * m


def _point_tiling(N, tile_n):
    """Pick a lane-aligned point tile and the padded point count (multiple of the tile)."""
    TN = min(tile_n, _round_up(N, 128))
    Np = _round_up(N, TN)
    return TN, Np, Np // TN


def _compiler_params(sem, block_bytes):
    """dimension_semantics + a VMEM limit sized to the double-buffered working set."""
    need = 2 * int(block_bytes) + (2 << 20)
    return pltpu.CompilerParams(
        dimension_semantics=sem,
        vmem_limit_bytes=int(min(max(need, 16 << 20), 100 << 20)))


def channel_mix(x, valid, w1f, w2, vecs, TN):
    B, C, Np = x.shape
    NT = Np // TN
    blk = 4 * (2 * C * TN + TN + 2 * C * C + 3 * C + 2 * C)
    return pl.pallas_call(
        channel_mix_kernel,
        out_shape=(jax.ShapeDtypeStruct((B, C, Np), x.dtype),
                   jax.ShapeDtypeStruct((B, C, 2), jnp.float32)),
        grid=(B, NT),
        in_specs=[
            pl.BlockSpec((1, C, TN), lambda b, n: (b, 0, n)),
            pl.BlockSpec((1, 1, TN), lambda b, n: (0, 0, n)),
            pl.BlockSpec((C, C), lambda b, n: (0, 0)),
            pl.BlockSpec((C, C), lambda b, n: (0, 0)),
            pl.BlockSpec((C, 3), lambda b, n: (0, 0)),
        ],
        out_specs=(
            pl.BlockSpec((1, C, TN), lambda b, n: (b, 0, n)),
            pl.BlockSpec((1, C, 2), lambda b, n: (b, 0, 0)),
        ),
        scratch_shapes=[pltpu.VMEM((C, 1), jnp.float32),
                        pltpu.VMEM((C, 1), jnp.float32)],
        compiler_params=_compiler_params(("parallel", "arbitrary"), blk),
    )(x, valid, w1f, w2, vecs)


def spatial_flatten(x, ci_col, wgt_col, sp_par, M, TN):
    B, C, Np = x.shape
    NT = Np // TN
    blk = 4 * (C * TN + 2 * TN + C * SP_COLS + C * M + TN * M)
    return pl.pallas_call(
        spatial_flatten_kernel,
        out_shape=jax.ShapeDtypeStruct((B, C, M), jnp.float32),
        grid=(B, NT),
        in_specs=[
            pl.BlockSpec((1, C, TN), lambda b, n: (b, 0, n)),
            pl.BlockSpec((1, TN, 1), lambda b, n: (b, n, 0)),
            pl.BlockSpec((1, TN, 1), lambda b, n: (b, n, 0)),
            pl.BlockSpec((C, SP_COLS), lambda b, n: (0, 0)),
        ],
        out_specs=pl.BlockSpec((1, C, M), lambda b, n: (b, 0, 0)),
        compiler_params=_compiler_params(("parallel", "arbitrary"), blk),
    )(x, ci_col, wgt_col, sp_par)


def spatial_ffn(u, masks, sp_par, H, W):
    B, C, M = u.shape
    blk = 4 * (2 * C * M + 9 * M + C * SP_COLS)
    return pl.pallas_call(
        functools.partial(spatial_ffn_kernel, H=H, W=W),
        out_shape=jax.ShapeDtypeStruct((B, C, M), jnp.float32),
        grid=(B,),
        in_specs=[
            pl.BlockSpec((1, C, M), lambda b: (b, 0, 0)),
            pl.BlockSpec((9, 1, M), lambda b: (0, 0, 0)),
            pl.BlockSpec((C, SP_COLS), lambda b: (0, 0)),
        ],
        out_specs=pl.BlockSpec((1, C, M), lambda b: (b, 0, 0)),
        compiler_params=_compiler_params(("parallel",), blk),
    )(u, masks, sp_par)


def spatial_inflate(x, v, ci_row, occ_row, valid, sp_par, TN):
    B, C, Np = x.shape
    M = v.shape[-1]
    NT = Np // TN
    blk = 4 * (2 * C * TN + 3 * TN + C * M + C * SP_COLS + M * TN + 2 * C)
    return pl.pallas_call(
        spatial_inflate_kernel,
        out_shape=(jax.ShapeDtypeStruct((B, C, Np), x.dtype),
                   jax.ShapeDtypeStruct((B, C, 2), jnp.float32)),
        grid=(B, NT),
        in_specs=[
            pl.BlockSpec((1, C, TN), lambda b, n: (b, 0, n)),
            pl.BlockSpec((1, C, M), lambda b, n: (b, 0, 0)),
            pl.BlockSpec((1, 1, TN), lambda b, n: (b, 0, n)),
            pl.BlockSpec((1, 1, TN), lambda b, n: (b, 0, n)),
            pl.BlockSpec((1, 1, TN), lambda b, n: (0, 0, n)),
            pl.BlockSpec((C, SP_COLS), lambda b, n: (0, 0)),
        ],
        out_specs=(
            pl.BlockSpec((1, C, TN), lambda b, n: (b, 0, n)),
            pl.BlockSpec((1, C, 2), lambda b, n: (b, 0, 0)),
        ),
        scratch_shapes=[pltpu.VMEM((C, 1), jnp.float32),
                        pltpu.VMEM((C, 1), jnp.float32)],
        compiler_params=_compiler_params(("parallel", "arbitrary"), blk),
    )(x, v, ci_row, occ_row, valid, sp_par)


# --------------------------------------------------------------------------------------
# Plain-JAX glue (per-point flatten weights, conv masks, BN folding, params)
# --------------------------------------------------------------------------------------

def flatten_point_weights(ci, occ, M):
    """weight_per_point = occ / (occ * points_per_cell[cell(point)] + 1e-6)  (torch semantics)."""
    def per_b(c, o):
        counts = jnp.zeros((M,), jnp.float32).at[c].add(o * o)
        per_point = o * counts[c]
        return o / (per_point + 1e-6)
    return jax.vmap(per_b)(ci, occ)


def build_tap_masks(H, W):
    """(9, 1, M) zero-padding validity masks for the 3x3 depthwise conv on the flattened grid."""
    M = H * W
    h = jnp.arange(M) // W
    w = jnp.arange(M) % W
    masks = []
    for di in (-1, 0, 1):
        for dj in (-1, 0, 1):
            valid = ((h + di >= 0) & (h + di < H) & (w + dj >= 0) & (w + dj < W))
            masks.append(valid.astype(jnp.float32))
    return jnp.stack(masks, axis=0).reshape(9, 1, M)


def channel_moments(x):
    """Per-channel (sum, sum-of-squares) over batch and points; x is (B, C, N) -> (C, 2)."""
    return jnp.stack([jnp.sum(x, axis=(0, 2)), jnp.sum(x * x, axis=(0, 2))], axis=1)


def bn_affine_from_moments(mom, count, gamma, beta, eps=1e-5):
    """Training-mode BatchNorm1d folded into per-channel scale/shift (biased variance)."""
    mean = mom[:, 0] / count
    var = jnp.maximum(mom[:, 1] / count - mean * mean, 0.0)
    scale = gamma / jnp.sqrt(var + eps)
    shift = beta - mean * scale
    return scale, shift


def init_params(key, C, depth):
    def nrm(k, shape, s=0.1):
        return (s * jax.random.normal(k, shape)).astype(jnp.float32)
    spatial, channel = [], []
    for _ in range(depth):
        key, *ks = jax.random.split(key, 15)
        spatial.append(dict(
            gamma=1.0 + nrm(ks[0], (C,)), beta=nrm(ks[1], (C,)),
            k1=nrm(ks[2], (C, 9)), b1=nrm(ks[3], (C,)),      # Conv2d(C,C,3,groups=C)
            k2=nrm(ks[4], (C, 9)), b2=nrm(ks[5], (C,)),
            ls=nrm(ks[6], (C,), 0.05)))                      # LayerScale (Conv1d groups=C)
        channel.append(dict(
            gamma=1.0 + nrm(ks[7], (C,)), beta=nrm(ks[8], (C,)),
            w1=nrm(ks[9], (C, C)), b1=nrm(ks[10], (C,)),     # Conv1d(C,C,1)
            w2=nrm(ks[11], (C, C)), b2=nrm(ks[12], (C,)),
            ls=nrm(ks[13], (C,), 0.05)))
    return {'spatial': spatial, 'channel': channel}


# --------------------------------------------------------------------------------------
# Pure-JAX reference (dense projections; independent of the Pallas formulation)
# --------------------------------------------------------------------------------------

def build_proj_matrices(cell_ind_g, occupied, num_cells):
    onehot = (cell_ind_g[:, None, :] ==
              jnp.arange(num_cells)[None, :, None]).astype(jnp.float32)      # (B, M, N)
    inflT = onehot * occupied[:, None, :]                                    # inflate^T
    counts = jnp.einsum('bmn,bn->bm', inflT, occupied)
    per_point = jnp.einsum('bmn,bm->bn', inflT, counts)
    weight = occupied / (per_point + 1e-6)
    flatT = jnp.swapaxes(onehot * weight[:, None, :], 1, 2)                  # flatten^T
    return flatT, inflT


def spatial_mix_ref(x, flatT, inflT, bn_s, bn_b, sm, H, W):
    B, C, N = x.shape
    xh = x * bn_s[None, :, None] + bn_b[None, :, None]
    cells = jnp.einsum('bcn,bnm->bcm', xh, flatT)
    g = cells.reshape(B, C, H, W)
    pd = jnp.pad(g, ((0, 0), (0, 0), (1, 1), (1, 1)))
    t = jnp.zeros_like(g)
    for i in range(3):
        for j in range(3):
            t = t + pd[:, :, i:i + H, j:j + W] * sm['k1'][:, 3 * i + j][None, :, None, None]
    t = jnp.maximum(t + sm['b1'][None, :, None, None], 0.0)
    pd = jnp.pad(t, ((0, 0), (0, 0), (1, 1), (1, 1)))
    u = jnp.zeros_like(g)
    for i in range(3):
        for j in range(3):
            u = u + pd[:, :, i:i + H, j:j + W] * sm['k2'][:, 3 * i + j][None, :, None, None]
    u = u + sm['b2'][None, :, None, None]
    pts = jnp.einsum('bcm,bmn->bcn', u.reshape(B, C, H * W), inflT)
    return x + pts * sm['ls'][None, :, None]


def channel_mix_ref(x, bn_s, bn_b, cm):
    xh = x * bn_s[None, :, None] + bn_b[None, :, None]
    h = jnp.einsum('oc,bcn->bon', cm['w1'], xh) + cm['b1'][None, :, None]
    h = jnp.maximum(h, 0.0)
    y = jnp.einsum('oc,bcn->bon', cm['w2'], h) + cm['b2'][None, :, None]
    return x + y * cm['ls'][None, :, None]


# --------------------------------------------------------------------------------------
# WaffleIron forward
# --------------------------------------------------------------------------------------

def waffleiron_forward(tokens, cell_ind, occupied, params, grids_shape,
                       use_pallas=True, tile_n=512):
    # tokens: (B, C, N); cell_ind: (B, G, N) int32; occupied: (B, N) float32
    B, C, N = tokens.shape
    count = B * N
    G = len(grids_shape)

    mom = channel_moments(tokens)                   # BN moments of the initial activations

    if use_pallas:
        TN, Np, _ = _point_tiling(N, tile_n)
        pad = Np - N
        x = jnp.pad(tokens, ((0, 0), (0, 0), (0, pad)))
        ci_pad = jnp.pad(cell_ind, ((0, 0), (0, 0), (0, pad)))
        occ_pad = jnp.pad(occupied, ((0, 0), (0, pad)))
        valid = (jnp.arange(Np) < N).astype(jnp.float32).reshape(1, 1, Np)
        proj = []
        for g, (H, W) in enumerate(grids_shape):
            M = H * W
            ci = ci_pad[:, g, :]
            wgt = flatten_point_weights(ci, occ_pad, M)
            proj.append(dict(ci_col=ci[:, :, None], wgt_col=wgt[:, :, None],
                             ci_row=ci[:, None, :], occ_row=occ_pad[:, None, :],
                             masks=build_tap_masks(H, W), H=H, W=W, M=M))
    else:
        x = tokens
        proj = []
        for g, (H, W) in enumerate(grids_shape):
            flatT, inflT = build_proj_matrices(cell_ind[:, g, :], occupied, H * W)
            proj.append(dict(flatT=flatT, inflT=inflT, H=H, W=W))

    for d, (sm, cm) in enumerate(zip(params['spatial'], params['channel'])):
        pj = proj[d % G]

        # ---- spatial mixer ----
        bn_s, bn_b = bn_affine_from_moments(mom, count, sm['gamma'], sm['beta'])
        if use_pallas:
            sp_par = jnp.concatenate(
                [sm['k1'], sm['k2'], bn_s[:, None], bn_b[:, None],
                 sm['b1'][:, None], sm['b2'][:, None], sm['ls'][:, None]], axis=1)  # (C, 23)
            u = spatial_flatten(x, pj['ci_col'], pj['wgt_col'], sp_par, pj['M'], TN)
            v = spatial_ffn(u, pj['masks'], sp_par, pj['H'], pj['W'])
            x, mom_b = spatial_inflate(x, v, pj['ci_row'], pj['occ_row'], valid, sp_par, TN)
            mom = jnp.sum(mom_b, axis=0)            # fused BN moments (no extra pass over x)
        else:
            x = spatial_mix_ref(x, pj['flatT'], pj['inflT'], bn_s, bn_b, sm, pj['H'], pj['W'])
            mom = channel_moments(x)

        # ---- channel mixer ----
        bn_s, bn_b = bn_affine_from_moments(mom, count, cm['gamma'], cm['beta'])
        if use_pallas:
            w1f = cm['w1'] * bn_s[None, :]          # fold BN affine into the first 1x1 conv
            b1f = cm['b1'] + cm['w1'] @ bn_b
            vecs = jnp.stack([b1f, cm['b2'], cm['ls']], axis=1)                     # (C, 3)
            x, mom_b = channel_mix(x, valid, w1f, cm['w2'], vecs, TN)
            mom = jnp.sum(mom_b, axis=0)
        else:
            x = channel_mix_ref(x, bn_s, bn_b, cm)
            mom = channel_moments(x)

    if use_pallas:
        x = x[:, :, :N]
    return x


# --------------------------------------------------------------------------------------
# Main
# --------------------------------------------------------------------------------------

if __name__ == "__main__":
    # NOTE: real WaffleIron uses MXU-aligned C (e.g. 768); the toy C=32 under-fills the MXU.
    B, C, N, depth = 2, 32, 1000, 3                 # N deliberately not a tile multiple
    grids_shape = [(16, 8), (8, 16)]                # both M = 128 cells (lane-aligned)

    key = jax.random.PRNGKey(0)
    k_tok, k_cell, k_occ, k_par = jax.random.split(key, 4)

    tokens = jax.random.normal(k_tok, (B, C, N), jnp.float32)
    cks = jax.random.split(k_cell, len(grids_shape))
    cell_ind = jnp.stack(
        [jax.random.randint(cks[g], (B, N), 0, grids_shape[g][0] * grids_shape[g][1])
         for g in range(len(grids_shape))], axis=1).astype(jnp.int32)          # (B, G, N)
    occupied = (jax.random.uniform(k_occ, (B, N)) > 0.1).astype(jnp.float32)   # (B, N)

    params = init_params(k_par, C, depth)

    out = waffleiron_forward(tokens, cell_ind, occupied, params, grids_shape,
                             use_pallas=True)
    out = jax.block_until_ready(out)

    ref = waffleiron_forward(tokens, cell_ind, occupied, params, grids_shape,
                             use_pallas=False)
    ref = jax.block_until_ready(ref)

    err = float(jnp.max(jnp.abs(out - ref)))
    assert err < 1e-3, f"Pallas output mismatch vs reference: {err}"
    print("KERNEL_OK")
</pallas_src>

<mosaic_0001>
module attributes {stable_mosaic.version = 11 : i64} {
  func.func @spatial_flatten_kernel(%arg0: i32, %arg1: i32, %arg2: memref<1x32x512xf32, #tpu.memory_space<vmem>>, %arg3: memref<1x512x1xi32, #tpu.memory_space<vmem>>, %arg4: memref<1x512x1xf32, #tpu.memory_space<vmem>>, %arg5: memref<32x23xf32, #tpu.memory_space<vmem>>, %arg6: memref<1x32x128xf32, #tpu.memory_space<vmem>>) attributes {dimension_semantics = [#tpu.dimension_semantics<parallel>, #tpu.dimension_semantics<arbitrary>], iteration_bounds = array<i64: 2, 2>, scalar_prefetch = 0 : i64, scratch_operands = 0 : i64, tpu.core_type = #tpu.core_type<tc>, window_params = [{transform_indices = @transform_0, window_bounds = array<i64: 1, 32, 512>}, {transform_indices = @transform_1, window_bounds = array<i64: 1, 512, 1>}, {transform_indices = @transform_2, window_bounds = array<i64: 1, 512, 1>}, {pipeline_mode = #tpu.pipeline_mode<synchronous>, transform_indices = @transform_3, window_bounds = array<i64: 32, 23>}, {transform_indices = @transform_4, window_bounds = array<i64: 1, 32, 128>}]} {
    %c0_i32 = arith.constant 0 : i32
    %0 = arith.cmpi eq, %arg1, %c0_i32 : i32
    %1 = arith.extui %0 : i1 to i32
    %c0_i32_0 = arith.constant 0 : i32
    %2 = arith.cmpi ne, %1, %c0_i32_0 : i32
    scf.if %2 {
      %cst_18 = arith.constant 0.000000e+00 : f32
      %30 = vector.broadcast %cst_18 : f32 to vector<32x128xf32>
      %c0_19 = arith.constant 0 : index
      %c0_20 = arith.constant 0 : index
      %c0_21 = arith.constant 0 : index
      %31 = vector.load %arg6[%c0_19, %c0_20, %c0_21] : memref<1x32x128xf32, #tpu.memory_space<vmem>>, vector<1x32x128xf32>
      %32 = vector.shape_cast %31 : vector<1x32x128xf32> to vector<32x128xf32>
      %33 = vector.shape_cast %30 : vector<32x128xf32> to vector<1x32x128xf32>
      tpu.vector_store %arg6[%c0_19, %c0_20, %c0_21], %33 {strides = array<i32>} : memref<1x32x128xf32, #tpu.memory_space<vmem>>, vector<1x32x128xf32>,
    } else {
    }
    %c0 = arith.constant 0 : index
    %c0_1 = arith.constant 0 : index
    %3 = vector.load %arg5[%c0, %c0_1] : memref<32x23xf32, #tpu.memory_space<vmem>>, vector<32x23xf32>
    %4 = vector.extract_strided_slice %3 {offsets = [0, 18], sizes = [32, 1], strides = [1, 1]} : vector<32x23xf32> to vector<32x1xf32>
    %5 = vector.extract_strided_slice %3 {offsets = [0, 19], sizes = [32, 1], strides = [1, 1]} : vector<32x23xf32> to vector<32x1xf32>
    %c0_2 = arith.constant 0 : index
    %c0_3 = arith.constant 0 : index
    %c0_4 = arith.constant 0 : index
    %6 = vector.load %arg2[%c0_2, %c0_3, %c0_4] : memref<1x32x512xf32, #tpu.memory_space<vmem>>, vector<1x32x512xf32>
    %7 = vector.shape_cast %6 : vector<1x32x512xf32> to vector<32x512xf32>
    %8 = vector.broadcast %4 : vector<32x1xf32> to vector<32x512xf32>
    %9 = arith.mulf %7, %8 : vector<32x512xf32>
    %10 = vector.broadcast %5 : vector<32x1xf32> to vector<32x512xf32>
    %11 = arith.addf %9, %10 : vector<32x512xf32>
    %c0_5 = arith.constant 0 : index
    %c0_6 = arith.constant 0 : index
    %c0_7 = arith.constant 0 : index
    %12 = vector.load %arg3[%c0_5, %c0_6, %c0_7] : memref<1x512x1xi32, #tpu.memory_space<vmem>>, vector<1x512x1xi32>
    %13 = vector.shape_cast %12 : vector<1x512x1xi32> to vector<512x1xi32>
    %c0_8 = arith.constant 0 : index
    %c0_9 = arith.constant 0 : index
    %c0_10 = arith.constant 0 : index
    %14 = vector.load %arg4[%c0_8, %c0_9, %c0_10] : memref<1x512x1xf32, #tpu.memory_space<vmem>>, vector<1x512x1xf32>
    %15 = vector.shape_cast %14 : vector<1x512x1xf32> to vector<512x1xf32>
    %16 = tpu.iota {dimensions = array<i32: 1>} : vector<512x128xi32>
    %17 = vector.broadcast %13 : vector<512x1xi32> to vector<512x128xi32>
    %18 = arith.cmpi eq, %17, %16 : vector<512x128xi32>
    %cst = arith.constant 0.000000e+00 : f32
    %19 = vector.shape_cast %15 : vector<512x1xf32> to vector<512x1xf32>
    %20 = vector.broadcast %19 : vector<512x1xf32> to vector<512x128xf32>
    %21 = vector.broadcast %cst : f32 to vector<512x128xf32>
    %22 = arith.select %18, %20, %21 : vector<512x128xi1>, vector<512x128xf32>
    %c0_11 = arith.constant 0 : index
    %c0_12 = arith.constant 0 : index
    %c0_13 = arith.constant 0 : index
    %23 = vector.load %arg6[%c0_11, %c0_12, %c0_13] : memref<1x32x128xf32, #tpu.memory_space<vmem>>, vector<1x32x128xf32>
    %24 = vector.shape_cast %23 : vector<1x32x128xf32> to vector<32x128xf32>
    %cst_14 = arith.constant dense<0.000000e+00> : vector<32x128xf32>
    %25 = tpu.matmul %11, %22, %cst_14 {dimension_numbers = #tpu.dot_dimension_numbers<[1], [0], [0], [1], [0, 0, 1, 1], [], []>} : vector<32x512xf32>, vector<512x128xf32>, vector<32x128xf32> -> vector<32x128xf32>
    %26 = arith.addf %24, %25 : vector<32x128xf32>
    %c0_15 = arith.constant 0 : index
    %c0_16 = arith.constant 0 : index
    %c0_17 = arith.constant 0 : index
    %27 = vector.load %arg6[%c0_15, %c0_16, %c0_17] : memref<1x32x128xf32, #tpu.memory_space<vmem>>, vector<1x32x128xf32>
    %28 = vector.shape_cast %27 : vector<1x32x128xf32> to vector<32x128xf32>
    %29 = vector.shape_cast %26 : vector<32x128xf32> to vector<1x32x128xf32>
    tpu.vector_store %arg6[%c0_15, %c0_16, %c0_17], %29 {strides = array<i32>} : memref<1x32x128xf32, #tpu.memory_space<vmem>>, vector<1x32x128xf32>,
    return
  }
  func.func @transform_0(%arg0: i32, %arg1: i32) -> (i32, i32, i32) {
    %c0_i32 = arith.constant 0 : i32
    %c0_i32_0 = arith.constant 0 : i32
    return %arg0, %c0_i32, %arg1 : i32, i32, i32
  }
  func.func @transform_1(%arg0: i32, %arg1: i32) -> (i32, i32, i32) {
    %c0_i32 = arith.constant 0 : i32
    %c0_i32_0 = arith.constant 0 : i32
    return %arg0, %arg1, %c0_i32 : i32, i32, i32
  }
  func.func @transform_2(%arg0: i32, %arg1: i32) -> (i32, i32, i32) {
    %c0_i32 = arith.constant 0 : i32
    %c0_i32_0 = arith.constant 0 : i32
    return %arg0, %arg1, %c0_i32 : i32, i32, i32
  }
  func.func @transform_3(%arg0: i32, %arg1: i32) -> (i32, i32) {
    %c0_i32 = arith.constant 0 : i32
    %c0_i32_0 = arith.constant 0 : i32
    %c0_i32_1 = arith.constant 0 : i32
    return %c0_i32, %c0_i32_0 : i32, i32
  }
  func.func @transform_4(%arg0: i32, %arg1: i32) -> (i32, i32, i32) {
    %c0_i32 = arith.constant 0 : i32
    %c0_i32_0 = arith.constant 0 : i32
    %c0_i32_1 = arith.constant 0 : i32
    return %arg0, %c0_i32, %c0_i32_0 : i32, i32, i32
  }
}

</mosaic_0001>

<bundles_post_ra>
// kernel: tpu_custom_call.1
= control target key start
LH: loop header
LB: loop body
LE: loop exit
PB: predicated region body
PF: predicated region fallthrough
CT: control target
= control target key end

     0   :  { %s2518_s0 = inlined_call_operand.vmem [shape: f32[2,32,1024], index: 0, kind: input, shape index: {}]   ;;  %s2519_s1 = inlined_call_operand.vmem [shape: s32[2,1024,1], index: 1, kind: input, shape index: {}]   ;;  %s2520_s2 = inlined_call_operand.vmem [shape: f32[2,1024,1], index: 2, kind: input, shape index: {}]   ;;  %s2521_s3 = inlined_call_operand.vmem [shape: f32[32,23], index: 3, kind: input, shape index: {}]   ;;  %s2522_s4 = inlined_call_operand.hbm [shape: f32[2,32,128], index: 4, kind: output, shape index: {}]  }
   0x1   :  { %2527 = sst [smem:[#allocation50_spill]] %s2518_s0 }
   0x2   :  { %9 = vsyncpa [#allocation4], 0 }
   0x3   :  { %11 = vsyncpa [#allocation4 + $0x1], 0  ;;  %s1795_s15 = smov 0   ;;  %s1797_s16 = smov 0  }
   0x4   :  { %s1799_s17 = smov 0   ;;  %s1801_s18 = smov 0  }
   0x5   :  { %s1803_s19 = smov 0   ;;  %s1805_s20 = smov 0  }
   0x6   :  { %s1807_s21 = smov 0   ;;  %s1809_s22 = smov 0  }
   0x7   :  { %s1811_s23 = smov 0   ;;  %s1813_s24 = smov 0  }
   0x8 LB: > { %2528 = sst [smem:[#allocation6_spill]] %s1758_s23  ;;  %s1463_s25 = sadd.s32 4294967295, %s1762_s24   ;;  %s1762_s24 = sphi %s1813_s24, %s17_s24   ;;  %s1758_s23 = sphi %s1811_s23, %s2620_s23   ;;  %s1754_s22 = sphi %s1809_s22, %s2627_s22   ;;  %s1750_s21 = sphi %s1807_s21, %s2618_s21   ;;  %s1746_s20 = sphi %s1805_s20, %s2626_s20   ;;  %s1742_s19 = sphi %s1803_s19, %s2625_s19   ;;  %s1738_s18 = sphi %s1801_s18, %s2624_s18   ;;  %s1734_s17 = sphi %s1799_s17, %s2623_s17   ;;  %s1730_s16 = sphi %s1797_s16, %s2622_s16   ;;  %s1726_s15 = sphi %s1795_s15, %s2621_s15  }
   0x9   : > { %s1464_s26 = sadd.s32 4294967294, %s1762_s24   ;;  %s26_s27 = sadd.s32 1, %s1754_s22 }
   0xa   : > { %s29_s28 = sadd.s32 1, %s1758_s23  ;;  %p27_p0 = scmp.ge.s32.totalorder %s26_s27, 2 }
   0xb   : > { %s38_s29 = sadd.s32 1, %s1742_s19  ;;  %p45_p1 = scmp.ne.s32.totalorder %s1742_s19, %s1738_s18 }
   0xc   : > { %p46_p2 = scmp.eq.s32.totalorder %s1762_s24, 0  ;;  %s2629_s27 = smov (%p27_p0, %s26_s27), 0 }
   0xd   : > { %2529 = sst [smem:[#allocation7_spill]] %s2629_s27  ;;  %s2631_s28 = smov (!%p27_p0, %s29_s28), %s1758_s23 }
   0xe   : > { %s34_s30 = ssub.s32 %s1754_s22, %s2629_s27  ;;  %p1858_p3 = por %p46_p2, %p45_p1 }
   0xf   : > { %p31_p4 = scmp.ge.s32.totalorder %s2631_s28, 2  ;;  %s141_s6 = sadd.s32 1, %s1734_s17 }
  0x10   : > { %p151_p5 = scmp.ne.s32.totalorder %s1734_s17, %s1730_s16  ;;  %p152_p6 = scmp.eq.s32.totalorder %s1463_s25, 3 }
  0x11   : > { %s2633_s28 = smov (%p31_p4, %s2631_s28), 0  ;;  %p157_p8 = scmp.ne.s32.totalorder %s1730_s16, %s1726_s15 }
  0x12   : > { %2531 = sst [smem:[#allocation8_spill]] %s2633_s28  ;;  %p1867_p7 = por %p152_p6, %p151_p5 }
  0x13   : > { %s33_s8 = ssub.s32 %s1758_s23, %s2633_s28  ;;  %p158_p9 = scmp.eq.s32.totalorder %s1464_s26, 3 }
  0x14   : > { %s35_s9 = sor.u32 %s34_s30, %s33_s8  ;;  %p139_p10 = scmp.eq.s32.totalorder %s33_s8, 0 }
  0x15   : > { %p36_p11 = scmp.eq.s32.totalorder %s35_s9, 0  ;;  %p1875_p12 = por %p158_p9, %p157_p8 }
  0x16   : > { %s1880_s11 = scalar_select %p139_p10, %s1734_s17, %s141_s6  }
  0x17   : > { %s1883_s12 = scalar_select %p36_p11, %s1742_s19, %s38_s29  }
  0x18   : > { %p1466_p13 = scmp.ge.s32.totalorder %s1762_s24, 4 }
  0x1a   : > { %177 = sbr.rel (%p1466_p13) target bundleno = 57 (0x39), region = 20 }
  0x1f   : > { %180 = sbr.rel (!%p1858_p3) target bundleno = 57 (0x39), region = 24  ;;  %s182_s13 = sand.u32 (%p1858_p3), 1, %s1742_s19  }
  0x20   : > { %s1468_s14 = sshll.u32 (%p1858_p3), %s1754_s22, 2  ;;  %s1467_s25 = sshll.u32 (%p1858_p3), %s182_s13, 7 }
  0x21   : > { %s1469_s26 = sshll.u32 (%p1858_p3), %s1758_s23, 5  ;;  %s2534_s0 = sld [smem:[#allocation50_spill]] (%p1858_p3) }
  0x22   : > { %s187_s30 = sadd.s32 (%p1858_p3), %s1469_s26, %s1468_s14  ;;  %s184_s5 = scalar_lea.vmem (%p1858_p3), [#allocation2], %s1467_s25 }
  0x23   : > { %s1470_s8 = sshll.u32 (%p1858_p3), %s187_s30, 3 }
  0x27   : > { %s1894_s29 = scalar_lea.vmem %s2534_s0, %s1470_s8 }
  0x28   : > { %v202_v0 = vld [vmem:[%s1894_s29] sm:$0xff]  ;;  %v204_v1 = vld [vmem:[%s1894_s29 + $0x8] sm:$0xff]  ;;  %v206_v2 = vld [vmem:[%s1894_s29 + $0x10] sm:$0xff] }
  0x29   : > { %203 = vst [vmem:[%s184_s5] sm:$0xff] %v202_v0  ;;  %v208_v3 = vld [vmem:[%s1894_s29 + $0x18] sm:$0xff]  ;;  %v210_v4 = vld [vmem:[%s1894_s29 + $0x40] sm:$0xff]  ;;  %v212_v5 = vld [vmem:[%s1894_s29 + $0x48] sm:$0xff] }
  0x2a   : > { %205 = vst [vmem:[%s184_s5 + $0x8] sm:$0xff] %v204_v1  ;;  %v214_v6 = vld [vmem:[%s1894_s29 + $0x50] sm:$0xff]  ;;  %v216_v7 = vld [vmem:[%s1894_s29 + $0x58] sm:$0xff]  ;;  %v218_v8 = vld [vmem:[%s1894_s29 + $0x80] sm:$0xff] }
  0x2b   : > { %207 = vst [vmem:[%s184_s5 + $0x10] sm:$0xff] %v206_v2  ;;  %v220_v9 = vld [vmem:[%s1894_s29 + $0x88] sm:$0xff]  ;;  %v222_v10 = vld [vmem:[%s1894_s29 + $0x90] sm:$0xff]  ;;  %v224_v11 = vld [vmem:[%s1894_s29 + $0x98] sm:$0xff] }
  0x2c   : > { %209 = vst [vmem:[%s184_s5 + $0x18] sm:$0xff] %v208_v3  ;;  %v226_v12 = vld [vmem:[%s1894_s29 + $0xc0] sm:$0xff]  ;;  %v228_v13 = vld [vmem:[%s1894_s29 + $0xc8] sm:$0xff]  ;;  %v230_v14 = vld [vmem:[%s1894_s29 + $0xd0] sm:$0xff] }
  0x2d   : > { %211 = vst [vmem:[%s184_s5 + $0x20] sm:$0xff] %v210_v4  ;;  %v232_v15 = vld [vmem:[%s1894_s29 + $0xd8] sm:$0xff] }
  0x2e   : > { %213 = vst [vmem:[%s184_s5 + $0x28] sm:$0xff] %v212_v5 }
  0x2f   : > { %215 = vst [vmem:[%s184_s5 + $0x30] sm:$0xff] %v214_v6 }
  0x30   : > { %217 = vst [vmem:[%s184_s5 + $0x38] sm:$0xff] %v216_v7 }
  0x31   : > { %219 = vst [vmem:[%s184_s5 + $0x40] sm:$0xff] %v218_v8 }
  0x32   : > { %221 = vst [vmem:[%s184_s5 + $0x48] sm:$0xff] %v220_v9 }
  0x33   : > { %223 = vst [vmem:[%s184_s5 + $0x50] sm:$0xff] %v222_v10 }
  0x34   : > { %225 = vst [vmem:[%s184_s5 + $0x58] sm:$0xff] %v224_v11 }
  0x35   : > { %227 = vst [vmem:[%s184_s5 + $0x60] sm:$0xff] %v226_v12 }
  0x36   : > { %229 = vst [vmem:[%s184_s5 + $0x68] sm:$0xff] %v228_v13 }
  0x37   : > { %231 = vst [vmem:[%s184_s5 + $0x70] sm:$0xff] %v230_v14 }
  0x38   : > { %233 = vst [vmem:[%s184_s5 + $0x78] sm:$0xff] %v232_v15 }
  0x39 PF: > { %p1471_p0 = scmp.ge.s32.totalorder %s1762_s24, 1  ;;  %p264_p1 = scmp.lt.s32.totalorder %s1762_s24, 5 }
  0x3b   : > { %p265_p2 = pnand %p1471_p0, %p264_p1 }
  0x3d   : > { %268 = sbr.rel (%p265_p2) target bundleno = 731 (0x2db), region = 55 }
  0x42   : > { %s271_s13 = sand.u32 1, %s1738_s18   ;;  %s2526_s14 = sand.u32 1, %s1730_s16  }
  0x43   : > { %s1472_s25 = sshll.u32 %s271_s13, 7  ;;  %s1473_s26 = sshll.u32 %s2526_s14, 5 }
  0x44   : > { %s1474_s30 = sshll.u32 %s1746_s20, 6  ;;  %p316_p3 = scmp.lt.s32.totalorder %s1750_s21, 1 }
  0x45   : > { %p318_p4 = scmp.lt.s32.totalorder %s1474_s30, 127  ;;  %s1931_s13 = scalar_lea.vmem [#allocation2], %s1472_s25 }
  0x46   : > { %s317_s8 = scalar_select %p316_p3, %s1750_s21, 1 }
  0x47   : > { %s2635_s30 = smov (!%p318_p4, %s1474_s30), 127  ;;  %s1933_s14 = scalar_lea.vmem [#allocation3], %s1473_s26 }
  0x48   : > { %s1475_s9 = sshll.u32 %s317_s8, 7  ;;  %p1480_p5 = scmp.ne.s32.totalorder %s1746_s20, 0 }
  0x49   : > { %s321_s6 = sadd.s32 %s1475_s9, %s2635_s30 }
  0x4a   : > { %s1476_s29 = sshll.u32 %s321_s6, 3  ;;  %338 = sbr.rel (%p1480_p5) target bundleno = 84 (0x54), region = 63 }
  0x4b   : > { %s1924_s28 = scalar_lea.vmem %s2519_s1, %s1476_s29  ;;  %s1929_s18 = scalar_lea.vmem %s2520_s2, %s1476_s29 }
  0x4f   : > { %v1764_v16 = vmov 0.0  }
  0x50   : > { %339 = vst [vmem:[%s1933_s14] sm:$0xff] %v1764_v16 }
  0x51   : > { %340 = vst [vmem:[%s1933_s14 + $0x8] sm:$0xff] %v1764_v16 }
  0x52   : > { %341 = vst [vmem:[%s1933_s14 + $0x10] sm:$0xff] %v1764_v16 }
  0x53   : > { %342 = vst [vmem:[%s1933_s14 + $0x18] sm:$0xff] %v1764_v16 }
  0x54 PF: > { %v345_v17 = vld [vmem:[%s2521_s3 + $0x10] sm:$0xff]  ;;  %v343_v18 = vld [vmem:[%s2521_s3] sm:$0xff]  ;;  %v1765_v19 = vmov 19   ;;  %v1766_v20 = vmov 18   ;;  %v346_v21 = vld [vmem:[%s2521_s3 + $0x18] sm:$0xff]  ;;  %v1767_v24 = vmov 0  }
  0x55   : > { %1646 = vset.pattern.permute.xlu2 %v1765_v19  ;;  %1645 = vset.pattern.permute.xlu1 %v1766_v20  ;;  %v344_v22 = vld [vmem:[%s2521_s3 + $0x8] sm:$0xff]  ;;  %v431_v23 = vld [vmem:[%s1924_s28] sm:$0xff]  ;;  %v433_v25 = vld [vmem:[%s1924_s28 + $0x10] sm:$0xff]  ;;  %s1342_s5 = sshll.u32 %s1933_s14, 4  ;;  %s1672_s20 = scalar_lea.hbm %s2522_s4, 64  ;;  %s1343_s5 = int_to_ptr.vmem [resolvable:$true] %s1342_s5 }
  0x56   : > { %1644 = vset.pattern.permute.xlu0 %v1766_v20  ;;  %375 = vperm.xlu1 %1645, %v345_v17   ;;  %v432_v26 = vld [vmem:[%s1924_s28 + $0x8] sm:$0xff]  ;;  %v434_v27 = vld [vmem:[%s1924_s28 + $0x18] sm:$0xff]  ;;  %v435_v29 = vld [vmem:[%s1924_s28 + $0x20] sm:$0xff] }
  0x57   : > { %400 = vperm.xlu2 %1646, %v343_v18   ;;  %365 = vperm.xlu0 %1644, %v343_v18   ;;  %v436_v28 = vld [vmem:[%s1924_s28 + $0x28] sm:$0xff]  ;;  %v439_v30 = vld [vmem:[%s1924_s28 + $0x40] sm:$0xff]  ;;  %v438_v31 = vld [vmem:[%s1924_s28 + $0x38] sm:$0xff] }
  0x58   : > { %v437_v32 = vld [vmem:[%s1924_s28 + $0x30] sm:$0xff]  ;;  %v442_v33 = vld [vmem:[%s1924_s28 + $0x58] sm:$0xff]  ;;  %v440_v35 = vld [vmem:[%s1924_s28 + $0x48] sm:$0xff] }
  0x59   : > { %v441_v34 = vld [vmem:[%s1924_s28 + $0x50] sm:$0xff]  ;;  %v444_v37 = vld [vmem:[%s1924_s28 + $0x68] sm:$0xff]  ;;  %v443_v38 = vld [vmem:[%s1924_s28 + $0x60] sm:$0xff] }
  0x5a   : > { %v445_v36 = vld [vmem:[%s1924_s28 + $0x70] sm:$0xff]  ;;  %v448_v39 = vld [vmem:[%s1924_s28 + $0x88] sm:$0xff]  ;;  %v447_v40 = vld [vmem:[%s1924_s28 + $0x80] sm:$0xff] }
  0x5b   : > { %v446_v41 = vld [vmem:[%s1924_s28 + $0x78] sm:$0xff]  ;;  %v451_v42 = vld [vmem:[%s1924_s28 + $0xa0] sm:$0xff]  ;;  %v449_v44 = vld [vmem:[%s1924_s28 + $0x90] sm:$0xff] }
  0x5c   : > { %v450_v43 = vld [vmem:[%s1924_s28 + $0x98] sm:$0xff]  ;;  %v453_v46 = vld [vmem:[%s1924_s28 + $0xb0] sm:$0xff]  ;;  %v452_v47 = vld [vmem:[%s1924_s28 + $0xa8] sm:$0xff] }
  0x5d   : > { %v454_v45 = vld [vmem:[%s1924_s28 + $0xb8] sm:$0xff]  ;;  %v457_v48 = vld [vmem:[%s1924_s28 + $0xd0] sm:$0xff]  ;;  %v456_v49 = vld [vmem:[%s1924_s28 + $0xc8] sm:$0xff] }
  0x5e   : > { %380 = vperm.xlu1 %1645, %v346_v21   ;;  %v455_v50 = vld [vmem:[%s1924_s28 + $0xc0] sm:$0xff]  ;;  %v460_v51 = vld [vmem:[%s1924_s28 + $0xe8] sm:$0xff]  ;;  %v458_v54 = vld [vmem:[%s1924_s28 + $0xd8] sm:$0xff] }
  0x5f   : > { %404 = vperm.xlu2 %1646, %v344_v22   ;;  %370 = vperm.xlu0 %1644, %v344_v22   ;;  %v459_v53 = vld [vmem:[%s1924_s28 + $0xe0] sm:$0xff]  ;;  %v462_v57 = vld [vmem:[%s1924_s28 + $0xf8] sm:$0xff]  ;;  %v461_v58 = vld [vmem:[%s1924_s28 + $0xf0] sm:$0xff] }
  0x60   : > { %v463_v55 = vld [vmem:[%s1924_s28 + $0x100] sm:$0xff]  ;;  %v466_v59 = vld [vmem:[%s1924_s28 + $0x118] sm:$0xff]  ;;  %v465_v61 = vld [vmem:[%s1924_s28 + $0x110] sm:$0xff] }
  0x61   : > { %v464_v62 = vld [vmem:[%s1924_s28 + $0x108] sm:$0xff]  ;;  %v469_v63 = vld [vmem:[%s1924_s28 + $0x130] sm:$0xff]  ;;  %v347_v0 = vld [vmem:[%s1931_s13] sm:$0xff] }
  0x62   : > { %v348_v1 = vld [vmem:[%s1931_s13 + $0x8] sm:$0xff]  ;;  %v349_v2 = vld [vmem:[%s1931_s13 + $0x10] sm:$0xff]  ;;  %v350_v3 = vld [vmem:[%s1931_s13 + $0x18] sm:$0xff] }
  0x63   : > { %v468_v15 = vld [vmem:[%s1924_s28 + $0x128] sm:$0xff]  ;;  %v467_v16 = vld [vmem:[%s1924_s28 + $0x120] sm:$0xff]  ;;  %v353_v20 = vld [vmem:[%s1931_s13 + $0x30] sm:$0xff] }
  0x64   : > { %v351_v18 = vld [vmem:[%s1931_s13 + $0x20] sm:$0xff] }
  0x66   : > { %1648 = vset.pattern.permute.xlu1 %v1765_v19 }
  0x67   : > { %1649 = vset.pattern.permute.xlu2 %v1767_v24  ;;  %1647 = vset.pattern.permute.xlu0 %v1765_v19  ;;  %v352_v19 = vld [vmem:[%s1931_s13 + $0x28] sm:$0xff] }
  0x68   : > { %412 = vperm.xlu1 %1648, %v346_v21   ;;  %562 = vperm.xlu2 %1649, %v431_v23   ;;  %v354_v21 = vld [vmem:[%s1931_s13 + $0x38] sm:$0xff] }
  0x69   : > { %408 = vperm.xlu0 %1647, %v345_v17   ;;  %v472_v17 = vld [vmem:[%s1924_s28 + $0x148] sm:$0xff] }
  0x70   : > { %1650 = vset.pattern.permute.xlu1 %v1767_v24  ;;  %568 = vperm.xlu2 %1649, %v433_v25  }
  0x71   : > { %1651 = vset.pattern.permute.xlu0 %v1767_v24  ;;  %565 = vperm.xlu1 %1650, %v432_v26  }
  0x72   : > { %571 = vperm.xlu0 %1651, %v434_v27  }
  0x78   : > { %577 = vperm.xlu2 %1649, %v436_v28  }
  0x79   : > { %574 = vperm.xlu1 %1650, %v435_v29  }
  0x7a   : > { %586 = vperm.xlu0 %1651, %v439_v30  }
  0x80   : > { %583 = vperm.xlu2 %1649, %v438_v31  }
  0x81   : > { %580 = vperm.xlu1 %1650, %v437_v32  }
  0x82   : > { %595 = vperm.xlu0 %1651, %v442_v33   ;;  %v471_v33 = vld [vmem:[%s1924_s28 + $0x140] sm:$0xff] }
  0x88   : > { %592 = vperm.xlu2 %1649, %v441_v34   ;;  %v355_v34 = vld [vmem:[%s1931_s13 + $0x40] sm:$0xff] }
  0x89   : > { %589 = vperm.xlu1 %1650, %v440_v35   ;;  %v359_v35 = vld [vmem:[%s1931_s13 + $0x60] sm:$0xff] }
  0x8a   : > { %604 = vperm.xlu0 %1651, %v445_v36   ;;  %v356_v36 = vld [vmem:[%s1931_s13 + $0x48] sm:$0xff] }
  0x90   : > { %601 = vperm.xlu2 %1649, %v444_v37   ;;  %v470_v37 = vld [vmem:[%s1924_s28 + $0x138] sm:$0xff] }
  0x91   : > { %598 = vperm.xlu1 %1650, %v443_v38   ;;  %v360_v38 = vld [vmem:[%s1931_s13 + $0x68] sm:$0xff] }
  0x92   : > { %613 = vperm.xlu0 %1651, %v448_v39   ;;  %v361_v39 = vld [vmem:[%s1931_s13 + $0x70] sm:$0xff] }
  0x98   : > { %610 = vperm.xlu2 %1649, %v447_v40   ;;  %v475_v40 = vld [vmem:[%s1924_s28 + $0x160] sm:$0xff] }
  0x99   : > { %607 = vperm.xlu1 %1650, %v446_v41   ;;  %v357_v41 = vld [vmem:[%s1931_s13 + $0x50] sm:$0xff] }
  0x9a   : > { %622 = vperm.xlu0 %1651, %v451_v42   ;;  %v358_v42 = vld [vmem:[%s1931_s13 + $0x58] sm:$0xff] }
  0xa0   : > { %619 = vperm.xlu2 %1649, %v450_v43   ;;  %v362_v43 = vld [vmem:[%s1931_s13 + $0x78] sm:$0xff] }
  0xa1   : > { %616 = vperm.xlu1 %1650, %v449_v44  }
  0xa2   : > { %631 = vperm.xlu0 %1651, %v454_v45  }
  0xa8   : > { %628 = vperm.xlu2 %1649, %v453_v46  }
  0xa9   : > { %625 = vperm.xlu1 %1650, %v452_v47  }
  0xaa   : > { %640 = vperm.xlu0 %1651, %v457_v48  }
  0xb0   : > { %637 = vperm.xlu2 %1649, %v456_v49  }
  0xb1   : > { %634 = vperm.xlu1 %1650, %v455_v50   ;;  %v401_v52 = vpop.permute.xlu2 %400 }
  0xb2   : > { %649 = vperm.xlu0 %1651, %v460_v51  }
  0xb8   : > { %646 = vperm.xlu2 %1649, %v459_v53  }
  0xb9   : > { %643 = vperm.xlu1 %1650, %v458_v54   ;;  %v405_v56 = vpop.permute.xlu2 %404 }
  0xba   : > { %658 = vperm.xlu0 %1651, %v463_v55  }
  0xc0   : > { %655 = vperm.xlu2 %1649, %v462_v57  }
  0xc1   : > { %652 = vperm.xlu1 %1650, %v461_v58  }
  0xc2   : > { %667 = vperm.xlu0 %1651, %v466_v59   ;;  %v1986_v60 = vpop.permute.xlu2 %562 }
  0xc8   : > { %664 = vperm.xlu2 %1649, %v465_v61   ;;  %v376_v4 = vpop.permute.xlu1 %375 }
  0xc9   : > { %661 = vperm.xlu1 %1650, %v464_v62   ;;  %v366_v5 = vpop.permute.xlu0 %365  ;;  %v391_v49 = vmul.f32 %v376_v4, %v355_v34  ;;  %v392_v50 = vmul.f32 %v376_v4, %v356_v36  ;;  %v393_v51 = vmul.f32 %v376_v4, %v357_v41  ;;  %v486_v34 = vld [vmem:[%s1924_s28 + $0x1b8] sm:$0xff]  ;;  %v488_v41 = vld [vmem:[%s1924_s28 + $0x1c8] sm:$0xff] }
  0xca   : > { %676 = vperm.xlu0 %1651, %v469_v63   ;;  %v1995_v6 = vpop.permute.xlu2 %568  ;;  %v383_v7 = vmul.f32 %v366_v5, %v347_v0  ;;  %v384_v8 = vmul.f32 %v366_v5, %v348_v1  ;;  %v385_v9 = vmul.f32 %v366_v5, %v349_v2  ;;  %v386_v10 = vmul.f32 %v366_v5, %v350_v3  ;;  %v474_v63 = vld [vmem:[%s1924_s28 + $0x158] sm:$0xff]  ;;  %v473_v1 = vld [vmem:[%s1924_s28 + $0x150] sm:$0xff] }
  0xcb   : > { %v478_v2 = vld [vmem:[%s1924_s28 + $0x178] sm:$0xff] }
  0xcc   : > { %v1997_v11 = vadd.f32 %v401_v52, %v383_v7  ;;  %v1999_v12 = vadd.f32 %v401_v52, %v384_v8  ;;  %v2001_v13 = vadd.f32 %v401_v52, %v385_v9  ;;  %v2003_v14 = vadd.f32 %v401_v52, %v386_v10  ;;  %v477_v7 = vld [vmem:[%s1924_s28 + $0x170] sm:$0xff]  ;;  %v476_v8 = vld [vmem:[%s1924_s28 + $0x168] sm:$0xff]  ;;  %v490_v36 = vld [vmem:[%s1924_s28 + $0x1d8] sm:$0xff] }
  0xcd   : > { %v394_v52 = vmul.f32 %v376_v4, %v358_v42  ;;  %v481_v9 = vld [vmem:[%s1924_s28 + $0x190] sm:$0xff] }
  0xce   : > { %2535 = vst [vmem:[#allocation9_spill] sm:$0xff] %v1999_v12  ;;  %v493_v42 = vld [vmem:[%s1924_s28 + $0x1f0] sm:$0xff] }
  0xcf   : > { %2536 = vst [vmem:[#allocation10_spill] sm:$0xff] %v2001_v13  ;;  %v557_v13 = vld [vmem:[%s1929_s18 + $0x1f0] sm:$0xff] }
  0xd0   : > { %2537 = vst [vmem:[#allocation11_spill] sm:$0xff] %v2003_v14  ;;  %673 = vperm.xlu2 %1649, %v468_v15   ;;  %v381_v22 = vpop.permute.xlu1 %380  ;;  %v518_v14 = vld [vmem:[%s1929_s18 + $0xb8] sm:$0xff]  ;;  %v553_v12 = vld [vmem:[%s1929_s18 + $0x1d0] sm:$0xff] }
  0xd1   : > { %670 = vperm.xlu1 %1650, %v467_v16   ;;  %v371_v23 = vpop.permute.xlu0 %370  ;;  %v395_v44 = vmul.f32 %v381_v22, %v359_v35  ;;  %v396_v45 = vmul.f32 %v381_v22, %v360_v38  ;;  %v397_v46 = vmul.f32 %v381_v22, %v361_v39  ;;  %v398_v57 = vmul.f32 %v381_v22, %v362_v43  ;;  %v485_v35 = vld [vmem:[%s1924_s28 + $0x1b0] sm:$0xff] }
  0xd2   : > { %685 = vperm.xlu0 %1651, %v472_v17   ;;  %v2012_v24 = vpop.permute.xlu2 %577  ;;  %v387_v25 = vmul.f32 %v371_v23, %v351_v18  ;;  %v388_v26 = vmul.f32 %v371_v23, %v352_v19  ;;  %v389_v27 = vmul.f32 %v371_v23, %v353_v20  ;;  %v390_v28 = vmul.f32 %v371_v23, %v354_v21  ;;  %v480_v17 = vld [vmem:[%s1924_s28 + $0x188] sm:$0xff]  ;;  %v479_v18 = vld [vmem:[%s1924_s28 + $0x180] sm:$0xff] }
  0xd3   : > { %v484_v19 = vld [vmem:[%s1924_s28 + $0x1a8] sm:$0xff]  ;;  %v483_v23 = vld [vmem:[%s1924_s28 + $0x1a0] sm:$0xff] }
  0xd4   : > { %v2014_v29 = vadd.f32 %v405_v56, %v387_v25  ;;  %v2016_v30 = vadd.f32 %v405_v56, %v388_v26  ;;  %v2018_v31 = vadd.f32 %v405_v56, %v389_v27  ;;  %v2020_v32 = vadd.f32 %v405_v56, %v390_v28  ;;  %v482_v25 = vld [vmem:[%s1924_s28 + $0x198] sm:$0xff]  ;;  %v487_v26 = vld [vmem:[%s1924_s28 + $0x1c0] sm:$0xff] }
  0xd6   : > { %2538 = vst [vmem:[#allocation12_spill] sm:$0xff] %v2016_v30  ;;  %v538_v30 = vld [vmem:[%s1929_s18 + $0x158] sm:$0xff] }
  0xd7   : > { %2539 = vst [vmem:[#allocation13_spill] sm:$0xff] %v2018_v31  ;;  %v558_v31 = vld [vmem:[%s1929_s18 + $0x1f8] sm:$0xff] }
  0xd8   : > { %2540 = vst [vmem:[#allocation14_spill] sm:$0xff] %v2020_v32  ;;  %682 = vperm.xlu2 %1649, %v471_v33   ;;  %v520_v32 = vld [vmem:[%s1929_s18 + $0xc8] sm:$0xff] }
  0xd9   : > { %679 = vperm.xlu1 %1650, %v470_v37  }
  0xda   : > { %694 = vperm.xlu0 %1651, %v475_v40   ;;  %v413_v47 = vpop.permute.xlu1 %412  ;;  %v2033_v48 = vpop.permute.xlu2 %583  ;;  %v489_v40 = vld [vmem:[%s1924_s28 + $0x1d0] sm:$0xff] }
  0xdb   : > { %v409_v53 = vpop.permute.xlu0 %408  ;;  %v2035_v54 = vadd.f32 %v413_v47, %v395_v44  ;;  %v2037_v55 = vadd.f32 %v413_v47, %v396_v45  ;;  %v2039_v56 = vadd.f32 %v413_v47, %v397_v46  ;;  %v2050_v0 = vadd.f32 %v413_v47, %v398_v57  ;;  %v492_v46 = vld [vmem:[%s1924_s28 + $0x1e8] sm:$0xff]  ;;  %v491_v47 = vld [vmem:[%s1924_s28 + $0x1e0] sm:$0xff]  ;;  %v494_v57 = vld [vmem:[%s1924_s28 + $0x1f8] sm:$0xff]  ;;  %s1550_s28 = sshll.u32 %s1750_s21, 5  ;;  %s2617_s21 = sand.u32 1, %s1730_s16  }
  0xdc   : > { %v2041_v58 = vadd.f32 %v409_v53, %v391_v49  ;;  %v2043_v59 = vadd.f32 %v409_v53, %v392_v50  ;;  %v2045_v61 = vadd.f32 %v409_v53, %v393_v51  ;;  %v2047_v62 = vadd.f32 %v409_v53, %v394_v52  ;;  %v496_v49 = vld [vmem:[%s1929_s18 + $0x8] sm:$0xff]  ;;  %v495_v53 = vld [vmem:[%s1929_s18] sm:$0xff]  ;;  %s1341_s29 = scalar_lea.hbm %s2522_s4, %s1550_s28  ;;  %s1330_s13 = scalar_lea.sflag [#allocation4], %s2617_s21 }
  0xdd   : > { %2541 = vst [vmem:[#allocation15_spill] sm:$0xff] %v2037_v55  ;;  %v542_v55 = vld [vmem:[%s1929_s18 + $0x178] sm:$0xff] }
  0xde   : > { %2542 = vst [vmem:[#allocation16_spill] sm:$0xff] %v2039_v56  ;;  %v515_v56 = vld [vmem:[%s1929_s18 + $0xa0] sm:$0xff] }
  0xdf   : > { %2543 = vst [vmem:[#allocation17_spill] sm:$0xff] %v2043_v59  ;;  %v556_v59 = vld [vmem:[%s1929_s18 + $0x1e8] sm:$0xff] }
  0xe0   : > { %2544 = vst [vmem:[#allocation18_spill] sm:$0xff] %v2045_v61  ;;  %691 = vperm.xlu2 %1649, %v474_v63   ;;  %v499_v63 = vld [vmem:[%s1929_s18 + $0x20] sm:$0xff] }
  0xe1   : > { %2545 = vst [vmem:[#allocation19_spill] sm:$0xff] %v2047_v62  ;;  %688 = vperm.xlu1 %1650, %v473_v1   ;;  %v516_v62 = vld [vmem:[%s1929_s18 + $0xa8] sm:$0xff]  ;;  %v519_v61 = vld [vmem:[%s1929_s18 + $0xc0] sm:$0xff] }
  0xe2   : > { %2546 = vst [vmem:[#allocation20_spill] sm:$0xff] %v2050_v0  ;;  %703 = vperm.xlu0 %1651, %v478_v2   ;;  %v2054_v3 = vpop.permute.xlu2 %592  ;;  %v517_v0 = vld [vmem:[%s1929_s18 + $0xb0] sm:$0xff] }
  0xe3   : > { %v2056_v4 = vpop.permute.xlu1 %565 }
  0xe4   : > { %v2058_v5 = vpop.permute.xlu0 %571 }
  0xe8   : > { %700 = vperm.xlu2 %1649, %v477_v7  }
  0xe9   : > { %697 = vperm.xlu1 %1650, %v476_v8   ;;  %v498_v8 = vld [vmem:[%s1929_s18 + $0x18] sm:$0xff] }
  0xea   : > { %712 = vperm.xlu0 %1651, %v481_v9   ;;  %v2063_v10 = vpop.permute.xlu2 %601  ;;  %v497_v9 = vld [vmem:[%s1929_s18 + $0x10] sm:$0xff] }
  0xeb   : > { %v2065_v15 = vpop.permute.xlu1 %574 }
  0xec   : > { %v2067_v16 = vpop.permute.xlu0 %586 }
  0xf0   : > { %709 = vperm.xlu2 %1649, %v480_v17   ;;  %v502_v17 = vld [vmem:[%s1929_s18 + $0x38] sm:$0xff] }
  0xf1   : > { %706 = vperm.xlu1 %1650, %v479_v18  }
  0xf2   : > { %721 = vperm.xlu0 %1651, %v484_v19   ;;  %v2072_v20 = vpop.permute.xlu2 %610 }
  0xf3   : > { %2547 = vst [vmem:[#allocation21_spill] sm:$0xff] %v2072_v20  ;;  %v2074_v21 = vpop.permute.xlu1 %580  ;;  %v522_v20 = vld [vmem:[%s1929_s18 + $0xd8] sm:$0xff] }
  0xf4   : > { %v2076_v22 = vpop.permute.xlu0 %595 }
  0xf8   : > { %718 = vperm.xlu2 %1649, %v483_v23  }
  0xf9   : > { %715 = vperm.xlu1 %1650, %v482_v25   ;;  %v501_v25 = vld [vmem:[%s1929_s18 + $0x30] sm:$0xff] }
  0xfa   : > { %730 = vperm.xlu0 %1651, %v487_v26   ;;  %v2081_v27 = vpop.permute.xlu2 %619  ;;  %v500_v26 = vld [vmem:[%s1929_s18 + $0x28] sm:$0xff] }
  0xfb   : > { %2548 = vst [vmem:[#allocation22_spill] sm:$0xff] %v2081_v27  ;;  %v2083_v28 = vpop.permute.xlu1 %589 }
  0xfc   : > { %v2085_v33 = vpop.permute.xlu0 %604 }
 0x100   : > { %727 = vperm.xlu2 %1649, %v486_v34   ;;  %v505_v34 = vld [vmem:[%s1929_s18 + $0x50] sm:$0xff] }
 0x101   : > { %724 = vperm.xlu1 %1650, %v485_v35  }
 0x102   : > { %739 = vperm.xlu0 %1651, %v490_v36   ;;  %v2090_v37 = vpop.permute.xlu2 %628 }
 0x103   : > { %2549 = vst [vmem:[#allocation23_spill] sm:$0xff] %v2090_v37  ;;  %v2092_v38 = vpop.permute.xlu1 %598  ;;  %v550_v37 = vld [vmem:[%s1929_s18 + $0x1b8] sm:$0xff] }
 0x104   : > { %v2094_v39 = vpop.permute.xlu0 %613 }
 0x105   : > { %2550 = vst [vmem:[#allocation24_spill] sm:$0xff] %v2094_v39  ;;  %v535_v39 = vld [vmem:[%s1929_s18 + $0x140] sm:$0xff] }
 0x108   : > { %736 = vperm.xlu2 %1649, %v489_v40  }
 0x109   : > { %733 = vperm.xlu1 %1650, %v488_v41   ;;  %v504_v41 = vld [vmem:[%s1929_s18 + $0x48] sm:$0xff] }
 0x10a   : > { %748 = vperm.xlu0 %1651, %v493_v42   ;;  %v2099_v43 = vpop.permute.xlu2 %637  ;;  %v503_v42 = vld [vmem:[%s1929_s18 + $0x40] sm:$0xff] }
 0x10b   : > { %2551 = vst [vmem:[#allocation25_spill] sm:$0xff] %v2099_v43  ;;  %v2101_v44 = vpop.permute.xlu1 %607 }
 0x10c   : > { %v2103_v45 = vpop.permute.xlu0 %622 }
 0x10d   : > { %2552 = vst [vmem:[#allocation26_spill] sm:$0xff] %v2103_v45  ;;  %v534_v45 = vld [vmem:[%s1929_s18 + $0x138] sm:$0xff] }
 0x110   : > { %745 = vperm.xlu2 %1649, %v492_v46   ;;  %v508_v46 = vld [vmem:[%s1929_s18 + $0x68] sm:$0xff] }
 0x111   : > { %742 = vperm.xlu1 %1650, %v491_v47  }
 0x112   : > { %824 = vperm.xlu0 %1651, %v496_v49   ;;  %v2108_v50 = vpop.permute.xlu2 %646 }
 0x113   : > { %v2110_v51 = vpop.permute.xlu1 %616 }
 0x114   : > { %2553 = vst [vmem:[#allocation27_spill] sm:$0xff] %v2110_v51  ;;  %v2112_v52 = vpop.permute.xlu0 %631  ;;  %v533_v51 = vld [vmem:[%s1929_s18 + $0x130] sm:$0xff] }
 0x115   : > { %2554 = vst [vmem:[#allocation28_spill] sm:$0xff] %v2112_v52  ;;  %v530_v52 = vld [vmem:[%s1929_s18 + $0x118] sm:$0xff] }
 0x118   : > { %819 = vperm.xlu2 %1649, %v495_v53  }
 0x119   : > { %751 = vperm.xlu1 %1650, %v494_v57   ;;  %v507_v57 = vld [vmem:[%s1929_s18 + $0x60] sm:$0xff] }
 0x11a   : > { %839 = vperm.xlu0 %1651, %v499_v63   ;;  %v2117_v1 = vpop.permute.xlu2 %655  ;;  %v506_v63 = vld [vmem:[%s1929_s18 + $0x58] sm:$0xff] }
 0x11b   : > { %v2119_v2 = vpop.permute.xlu1 %625 }
 0x11c   : > { %2555 = vst [vmem:[#allocation29_spill] sm:$0xff] %v2119_v2  ;;  %v2121_v7 = vpop.permute.xlu0 %640 }
 0x11d   : > { %2556 = vst [vmem:[#allocation30_spill] sm:$0xff] %v2121_v7  ;;  %v547_v7 = vld [vmem:[%s1929_s18 + $0x1a0] sm:$0xff] }
 0x120   : > { %834 = vperm.xlu2 %1649, %v498_v8   ;;  %v511_v8 = vld [vmem:[%s1929_s18 + $0x80] sm:$0xff] }
 0x121   : > { %829 = vperm.xlu1 %1650, %v497_v9  }
 0x122   : > { %854 = vperm.xlu0 %1651, %v502_v17   ;;  %v2126_v18 = vpop.permute.xlu2 %664 }
 0x123   : > { %2557 = vst [vmem:[#allocation31_spill] sm:$0xff] %v2126_v18  ;;  %v2128_v19 = vpop.permute.xlu1 %634  ;;  %v524_v18 = vld [vmem:[%s1929_s18 + $0xe8] sm:$0xff] }
 0x124   : > { %2558 = vst [vmem:[#allocation32_spill] sm:$0xff] %v2128_v19  ;;  %v2130_v23 = vpop.permute.xlu0 %649  ;;  %v531_v19 = vld [vmem:[%s1929_s18 + $0x120] sm:$0xff] }
 0x128   : > { %849 = vperm.xlu2 %1649, %v501_v25  }
 0x129   : > { %844 = vperm.xlu1 %1650, %v500_v26   ;;  %v510_v26 = vld [vmem:[%s1929_s18 + $0x78] sm:$0xff] }
 0x12a   : > { %869 = vperm.xlu0 %1651, %v505_v34   ;;  %v2135_v35 = vpop.permute.xlu2 %673  ;;  %v509_v34 = vld [vmem:[%s1929_s18 + $0x70] sm:$0xff] }
 0x12b   : > { %2559 = vst [vmem:[#allocation33_spill] sm:$0xff] %v2135_v35  ;;  %v2137_v36 = vpop.permute.xlu1 %643  ;;  %v551_v35 = vld [vmem:[%s1929_s18 + $0x1c0] sm:$0xff] }
 0x12c   : > { %v2139_v40 = vpop.permute.xlu0 %658 }
 0x12d   : > { %2560 = vst [vmem:[#allocation34_spill] sm:$0xff] %v2139_v40  ;;  %v540_v40 = vld [vmem:[%s1929_s18 + $0x168] sm:$0xff] }
 0x130   : > { %864 = vperm.xlu2 %1649, %v504_v41   ;;  %v514_v41 = vld [vmem:[%s1929_s18 + $0x98] sm:$0xff] }
 0x131   : > { %859 = vperm.xlu1 %1650, %v503_v42  }
 0x132   : > { %884 = vperm.xlu0 %1651, %v508_v46   ;;  %v2144_v47 = vpop.permute.xlu2 %682 }
 0x133   : > { %v2146_v49 = vpop.permute.xlu1 %652 }
 0x134   : > { %v2148_v53 = vpop.permute.xlu0 %667 }
 0x135   : > { %2561 = vst [vmem:[#allocation35_spill] sm:$0xff] %v2148_v53  ;;  %v537_v53 = vld [vmem:[%s1929_s18 + $0x150] sm:$0xff] }
 0x138   : > { %879 = vperm.xlu2 %1649, %v507_v57  }
 0x139   : > { %874 = vperm.xlu1 %1650, %v506_v63   ;;  %v513_v63 = vld [vmem:[%s1929_s18 + $0x90] sm:$0xff] }
 0x13a   : > { %899 = vperm.xlu0 %1651, %v511_v8   ;;  %v2153_v9 = vpop.permute.xlu2 %691  ;;  %v512_v8 = vld [vmem:[%s1929_s18 + $0x88] sm:$0xff] }
 0x13b   : > { %v2155_v17 = vpop.permute.xlu1 %661 }
 0x13c   : > { %2562 = vst [vmem:[#allocation36_spill] sm:$0xff] %v2155_v17  ;;  %v2157_v25 = vpop.permute.xlu0 %676  ;;  %v526_v17 = vld [vmem:[%s1929_s18 + $0xf8] sm:$0xff] }
 0x13d   : > { %2563 = vst [vmem:[#allocation37_spill] sm:$0xff] %v2157_v25  ;;  %v549_v25 = vld [vmem:[%s1929_s18 + $0x1b0] sm:$0xff] }
 0x140   : > { %894 = vperm.xlu2 %1649, %v510_v26  }
 0x141   : > { %889 = vperm.xlu1 %1650, %v509_v34  }
 0x142   : > { %914 = vperm.xlu0 %1651, %v514_v41   ;;  %v2162_v42 = vpop.permute.xlu2 %700 }
 0x143   : > { %v2164_v46 = vpop.permute.xlu1 %670 }
 0x144   : > { %2564 = vst [vmem:[#allocation38_spill] sm:$0xff] %v2164_v46  ;;  %v2166_v57 = vpop.permute.xlu0 %685  ;;  %v523_v46 = vld [vmem:[%s1929_s18 + $0xe0] sm:$0xff] }
 0x148   : > { %909 = vperm.xlu2 %1649, %v513_v63  }
 0x149   : > { %904 = vperm.xlu1 %1650, %v512_v8  }
 0x14a   : > { %929 = vperm.xlu0 %1651, %v517_v0   ;;  %v2171_v26 = vpop.permute.xlu2 %709 }
 0x14b   : > { %2565 = vst [vmem:[#allocation39_spill] sm:$0xff] %v2171_v26  ;;  %v2173_v34 = vpop.permute.xlu1 %679  ;;  %v541_v26 = vld [vmem:[%s1929_s18 + $0x170] sm:$0xff] }
 0x14c   : > { %2566 = vst [vmem:[#allocation40_spill] sm:$0xff] %v2173_v34  ;;  %v2175_v41 = vpop.permute.xlu0 %694  ;;  %v532_v34 = vld [vmem:[%s1929_s18 + $0x128] sm:$0xff] }
 0x150   : > { %924 = vperm.xlu2 %1649, %v516_v62  }
 0x151   : > { %919 = vperm.xlu1 %1650, %v515_v56  }
 0x152   : > { %944 = vperm.xlu0 %1651, %v520_v32   ;;  %v2180_v63 = vpop.permute.xlu2 %718 }
 0x153   : > { %2567 = vst [vmem:[#allocation41_spill] sm:$0xff] %v2180_v63  ;;  %v2182_v8 = vpop.permute.xlu1 %688  ;;  %v525_v63 = vld [vmem:[%s1929_s18 + $0xf0] sm:$0xff] }
 0x154   : > { %v2184_v0 = vpop.permute.xlu0 %703 }
 0x158   : > { %939 = vperm.xlu2 %1649, %v519_v61  }
 0x159   : > { %934 = vperm.xlu1 %1650, %v518_v14  }
 0x15a   : > { %1134 = vperm.xlu0 %1651, %v558_v31   ;;  %v2189_v62 = vpop.permute.xlu2 %727 }
 0x15b   : > { %2568 = vst [vmem:[#allocation42_spill] sm:$0xff] %v2189_v62  ;;  %v2191_v56 = vpop.permute.xlu1 %697  ;;  %v521_v62 = vld [vmem:[%s1929_s18 + $0xd0] sm:$0xff] }
 0x15c   : > { %v2193_v32 = vpop.permute.xlu0 %712 }
 0x15d   : > { %2569 = vst [vmem:[#allocation43_spill] sm:$0xff] %v2193_v32  ;;  %v539_v32 = vld [vmem:[%s1929_s18 + $0x160] sm:$0xff] }
 0x160   : > { %1049 = vperm.xlu2 %1649, %v541_v26  }
 0x161   : > { %1054 = vperm.xlu1 %1650, %v542_v55  }
 0x162   : > { %1129 = vperm.xlu0 %1651, %v557_v13   ;;  %v2198_v61 = vpop.permute.xlu2 %736 }
 0x163   : > { %v2200_v14 = vpop.permute.xlu1 %706 }
 0x164   : > { %2570 = vst [vmem:[#allocation44_spill] sm:$0xff] %v2200_v14  ;;  %v2202_v31 = vpop.permute.xlu0 %721  ;;  %v555_v14 = vld [vmem:[%s1929_s18 + $0x1e0] sm:$0xff] }
 0x165   : > { %2571 = vst [vmem:[#allocation45_spill] sm:$0xff] %v2202_v31  ;;  %v536_v31 = vld [vmem:[%s1929_s18 + $0x148] sm:$0xff] }
 0x168   : > { %1044 = vperm.xlu2 %1649, %v540_v40  }
 0x169   : > { %974 = vperm.xlu1 %1650, %v526_v17  }
 0x16a   : > { %1124 = vperm.xlu0 %1651, %v556_v59   ;;  %v2207_v26 = vpop.permute.xlu2 %745 }
 0x16b   : > { %v2209_v55 = vpop.permute.xlu1 %715 }
 0x16c   : > { %2572 = vst [vmem:[#allocation46_spill] sm:$0xff] %v2209_v55  ;;  %v2211_v13 = vpop.permute.xlu0 %730  ;;  %v554_v55 = vld [vmem:[%s1929_s18 + $0x1d8] sm:$0xff] }
 0x170   : > { %1039 = vperm.xlu2 %1649, %v539_v32  }
 0x171   : > { %969 = vperm.xlu1 %1650, %v525_v63  }
 0x172   : > { %1119 = vperm.xlu0 %1651, %v555_v14   ;;  %v2216_v40 = vpop.permute.xlu2 %819 }
 0x173   : > { %v2218_v17 = vpop.permute.xlu1 %724 }
 0x174   : > { %2573 = vst [vmem:[#allocation47_spill] sm:$0xff] %v2218_v17  ;;  %v2220_v59 = vpop.permute.xlu0 %739  ;;  %v552_v17 = vld [vmem:[%s1929_s18 + $0x1c8] sm:$0xff] }
 0x178   : > { %1034 = vperm.xlu2 %1649, %v538_v30  }
 0x179   : > { %964 = vperm.xlu1 %1650, %v524_v18  }
 0x17a   : > { %1114 = vperm.xlu0 %1651, %v554_v55   ;;  %v2225_v32 = vpop.permute.xlu2 %834 }
 0x17b   : > { %v2227_v63 = vpop.permute.xlu1 %733 }
 0x17c   : > { %v2229_v14 = vpop.permute.xlu0 %748 }
 0x180   : > { %1029 = vperm.xlu2 %1649, %v537_v53  }
 0x181   : > { %959 = vperm.xlu1 %1650, %v523_v46  }
 0x182   : > { %1109 = vperm.xlu0 %1651, %v553_v12   ;;  %v2234_v30 = vpop.permute.xlu2 %849 }
 0x183   : > { %v2236_v18 = vpop.permute.xlu1 %742 }
 0x184   : > { %v2238_v55 = vpop.permute.xlu0 %824 }
 0x188   : > { %1024 = vperm.xlu2 %1649, %v536_v31  }
 0x189   : > { %954 = vperm.xlu1 %1650, %v522_v20   ;;  %v559_v20 = vlaneseq }
 0x18a   : > { %1104 = vperm.xlu0 %1651, %v552_v17   ;;  %v2243_v53 = vpop.permute.xlu2 %864 }
 0x18b   : > { %v2245_v46 = vpop.permute.xlu1 %751  ;;  %v2259_v2 = vand.u32 127, %v559_v20  ;;  %v548_v20 = vld [vmem:[%s1929_s18 + $0x1a8] sm:$0xff] }
 0x18c   : > { %v2247_v12 = vpop.permute.xlu0 %839 }
 0x18d   : > { %vm768_vm0 = vcmp.eq.s32.totalorder %v2101_v44, %v2259_v2  ;;  %v546_v44 = vld [vmem:[%s1929_s18 + $0x198] sm:$0xff]  ;;  %vm767_vm1 = vcmp.eq.s32.totalorder %v2085_v33, %v2259_v2  ;;  %vm766_vm2 = vcmp.eq.s32.totalorder %v2063_v10, %v2259_v2  ;;  %vm765_vm3 = vcmp.eq.s32.totalorder %v2092_v38, %v2259_v2  ;;  %v543_v38 = vld [vmem:[%s1929_s18 + $0x180] sm:$0xff] }
 0x18e   : > { %vm764_vm4 = vcmp.eq.s32.totalorder %v2076_v22, %v2259_v2  ;;  %vm763_vm5 = vcmp.eq.s32.totalorder %v2054_v3, %v2259_v2  ;;  %vm762_vm6 = vcmp.eq.s32.totalorder %v2083_v28, %v2259_v2  ;;  %vm761_vm7 = vcmp.eq.s32.totalorder %v2067_v16, %v2259_v2 }
 0x18f   : > { %vm760_vm8 = vcmp.eq.s32.totalorder %v2033_v48, %v2259_v2  ;;  %vm759_vm9 = vcmp.eq.s32.totalorder %v2074_v21, %v2259_v2  ;;  %vm758_vm10 = vcmp.eq.s32.totalorder %v2012_v24, %v2259_v2  ;;  %vm757_vm11 = vcmp.eq.s32.totalorder %v2065_v15, %v2259_v2 }
 0x190   : > { %1019 = vperm.xlu2 %1649, %v535_v39   ;;  %vm756_vm12 = vcmp.eq.s32.totalorder %v2058_v5, %v2259_v2  ;;  %vm755_vm13 = vcmp.eq.s32.totalorder %v1995_v6, %v2259_v2  ;;  %vm816_vm14 = vcmp.eq.s32.totalorder %v2245_v46, %v2259_v2  ;;  %vm754_vm15 = vcmp.eq.s32.totalorder %v2056_v4, %v2259_v2 }
 0x191   : > { %949 = vperm.xlu1 %1650, %v521_v62  }
 0x192   : > { %1009 = vperm.xlu0 %1651, %v533_v51   ;;  %v880_v27 = vpop.permute.xlu2 %879 }
 0x193   : > { %v2252_v31 = vpop.permute.xlu1 %829 }
 0x194   : > { %v2254_v17 = vpop.permute.xlu0 %854 }
 0x198   : > { %1099 = vperm.xlu2 %1649, %v551_v35  }
 0x199   : > { %1014 = vperm.xlu1 %1650, %v534_v45  }
 0x19a   : > { %1089 = vperm.xlu0 %1651, %v549_v25   ;;  %v895_v39 = vpop.permute.xlu2 %894 }
 0x19b   : > { %v2263_v51 = vpop.permute.xlu1 %844  ;;  %1481 = vmatpush.msk.msra.mxu0 %vm768_vm0, %v895_v39  ;;  %vm753_vm0 = vcmp.eq.s32.totalorder %v1986_v60, %v2259_v2 }
 0x19c   : > { %v870_v62 = vpop.permute.xlu0 %869 }
 0x1a0   : > { %1004 = vperm.xlu2 %1649, %v532_v34  }
 0x1a1   : > { %1094 = vperm.xlu1 %1650, %v550_v37   ;;  %v529_v37 = vld [vmem:[%s1929_s18 + $0x110] sm:$0xff] }
 0x1a2   : > { %994 = vperm.xlu0 %1651, %v530_v52   ;;  %v2268_v45 = vpop.permute.xlu2 %909  ;;  %v527_v52 = vld [vmem:[%s1929_s18 + $0x100] sm:$0xff] }
 0x1a3   : > { %2574 = vst [vmem:[#allocation48_spill] sm:$0xff] %v2268_v45  ;;  %v860_v35 = vpop.permute.xlu1 %859 }
 0x1a4   : > { %v885_v25 = vpop.permute.xlu0 %884 }
 0x1a8   : > { %1084 = vperm.xlu2 %1649, %v548_v20  }
 0x1a9   : > { %999 = vperm.xlu1 %1650, %v531_v19  }
 0x1aa   : > { %1074 = vperm.xlu0 %1651, %v546_v44   ;;  %v2273_v39 = vpop.permute.xlu2 %924  ;;  %v545_v44 = vld [vmem:[%s1929_s18 + $0x190] sm:$0xff] }
 0x1ab   : > { %v875_v43 = vpop.permute.xlu1 %874 }
 0x1ac   : > { %v2275_v34 = vpop.permute.xlu0 %899 }
 0x1ad   : > { %2575 = vst [vmem:[#allocation49_spill] sm:$0xff] %v2275_v34  ;;  %v528_v34 = vld [vmem:[%s1929_s18 + $0x108] sm:$0xff] }
 0x1b0   : > { %989 = vperm.xlu2 %1649, %v529_v37   ;;  %v2597_v37 = vld [vmem:[#allocation35_spill] sm:$0xff] }
 0x1b1   : > { %1079 = vperm.xlu1 %1650, %v547_v7  }
 0x1b2   : > { %979 = vperm.xlu0 %1651, %v527_v52   ;;  %v2280_v45 = vpop.permute.xlu2 %939 }
 0x1b3   : > { %v890_v19 = vpop.permute.xlu1 %889 }
 0x1b4   : > { %v2284_v20 = vpop.permute.xlu0 %914  ;;  %1482 = vmatpush.msk.msra.mxu0 %vm767_vm1, %v890_v19  ;;  %vm800_vm1 = vcmp.eq.s32.totalorder %v2184_v0, %v2259_v2  ;;  %v2579_v0 = vld [vmem:[#allocation28_spill] sm:$0xff]  ;;  %v2598_v19 = vld [vmem:[#allocation31_spill] sm:$0xff] }
 0x1b6   : > { %1483 = vmatpush.msk.msra.mxu0 %vm766_vm2, %v885_v25  ;;  %vm815_vm2 = vcmp.eq.s32.totalorder %v2229_v14, %v2259_v2  ;;  %v2595_v25 = vld [vmem:[#allocation9_spill] sm:$0xff] }
 0x1b8   : > { %1069 = vperm.xlu2 %1649, %v545_v44   ;;  %1484 = vmatpush.msk.msra.mxu0 %vm765_vm3, %v880_v27  ;;  %v544_v27 = vld [vmem:[%s1929_s18 + $0x188] sm:$0xff]  ;;  %vm799_vm3 = vcmp.eq.s32.totalorder %v2162_v42, %v2259_v2  ;;  %v2600_v44 = vld [vmem:[#allocation41_spill] sm:$0xff]  ;;  %s1344_s18 = sshll.u32 %s1341_s29, 4  ;;  %s1345_s18 = int_to_ptr.hbm [resolvable:$true] %s1344_s18 }
 0x1b9   : > { %984 = vperm.xlu1 %1650, %v528_v34   ;;  %v2576_v42 = vld [vmem:[#allocation30_spill] sm:$0xff]  ;;  %s1666_s0 = sshra.s32 %s1345_s18, 4  ;;  %s1667_s0 = int_to_ptr.hbm [resolvable:$true] %s1666_s0 }
 0x1ba   : > { %v1050_v33 = vpop.permute.xlu2 %1049  ;;  %1485 = vmatpush.msk.msra.mxu0 %vm764_vm4, %v875_v43  ;;  %vm798_vm4 = vcmp.eq.s32.totalorder %v2191_v56, %v2259_v2  ;;  %s1668_s23 = scalar_lea.hbm %s1667_s0, 32  ;;  %p1673_p10 = scmp.lt.s32.totalorder %s1667_s0, %s2522_s4 }
 0x1bb   : > { %v2296_v10 = vpop.permute.xlu1 %904  ;;  %p1669_p6 = scmp.ne.s32.totalorder %s1667_s0, %s1668_s23  ;;  %p1674_p11 = scmp.lt.s32.totalorder %s1672_s20, %s1668_s23 }
 0x1bc   : > { %v2298_v7 = vpop.permute.xlu0 %929  ;;  %1486 = vmatpush.msk.msra.mxu0 %vm763_vm5, %v870_v62  ;;  %vm797_vm5 = vcmp.eq.s32.totalorder %v2175_v41, %v2259_v2  ;;  %v2577_v41 = vld [vmem:[#allocation25_spill] sm:$0xff] }
 0x1bd   : > { %v2593_v62 = vld [vmem:[#allocation45_spill] sm:$0xff]  ;;  %p1670_p8 = pnand %p1669_p6, %p1867_p7  ;;  %p1675_p13 = por %p1674_p11, %p1673_p10 }
 0x1be   : > { %1487 = vmatpush.msk.msra.mxu0 %vm762_vm6, %v2243_v53  ;;  %vm796_vm6 = vcmp.eq.s32.totalorder %v2153_v9, %v2259_v2 }
 0x1bf   : > { %p1671_p9 = pneg %p1670_p8 }
 0x1c0   : > { %1059 = vperm.xlu2 %1649, %v543_v38   ;;  %1488 = vmatpush.msk.msra.mxu0 %vm761_vm7, %v860_v35  ;;  %vm784_vm7 = vcmp.eq.s32.totalorder %v2117_v1, %v2259_v2  ;;  %v2602_v38 = vld [vmem:[#allocation43_spill] sm:$0xff] }
 0x1c1   : > { %1064 = vperm.xlu1 %1650, %v544_v27   ;;  %p1676_p0 = pnand %p1675_p13, %p1671_p9 }
 0x1c2   : > { %v1045_v3 = vpop.permute.xlu2 %1044  ;;  %1489 = vmatpush.msk.msra.mxu0 %vm760_vm8, %v2254_v17  ;;  %vm814_vm8 = vcmp.eq.s32.totalorder %v2207_v26, %v2259_v2  ;;  %v2581_v26 = vld [vmem:[#allocation40_spill] sm:$0xff]  ;;  %v2591_v17 = vld [vmem:[#allocation47_spill] sm:$0xff] }
 0x1c3   : > { %v2312_v22 = vpop.permute.xlu1 %919 }
 0x1c4   : > { %v2314_v28 = vpop.permute.xlu0 %944  ;;  %1490 = vmatpush.msk.msra.mxu0 %vm759_vm9, %v2234_v30  ;;  %vm795_vm9 = vcmp.eq.s32.totalorder %v2182_v8, %v2259_v2  ;;  %v2578_v8 = vld [vmem:[#allocation32_spill] sm:$0xff]  ;;  %v2586_v30 = vld [vmem:[#allocation22_spill] sm:$0xff] }
 0x1c6   : > { %1491 = vmatpush.msk.msra.mxu0 %vm758_vm10, %v2263_v51  ;;  %vm794_vm10 = vcmp.eq.s32.totalorder %v2166_v57, %v2259_v2  ;;  %v2592_v51 = vld [vmem:[#allocation21_spill] sm:$0xff] }
 0x1c8   : > { %1492 = vmatpush.msk.msra.mxu0 %vm757_vm11, %v2247_v12  ;;  %vm783_vm11 = vcmp.eq.s32.totalorder %v2146_v49, %v2259_v2  ;;  %v2589_v12 = vld [vmem:[#allocation48_spill] sm:$0xff] }
 0x1ca   : > { %v1040_v48 = vpop.permute.xlu2 %1039  ;;  %1493 = vmatpush.msk.msra.mxu0 %vm756_vm12, %v2225_v32  ;;  %vm813_vm12 = vcmp.eq.s32.totalorder %v2236_v18, %v2259_v2  ;;  %v2584_v32 = vld [vmem:[#allocation26_spill] sm:$0xff]  ;;  %v2587_v18 = vld [vmem:[#allocation27_spill] sm:$0xff] }
 0x1cb   : > { %v2328_v16 = vpop.permute.xlu1 %934 }
 0x1cc   : > { %v1135_v21 = vpop.permute.xlu0 %1134  ;;  %1494 = vmatpush.msk.msra.mxu0 %vm755_vm13, %v2252_v31  ;;  %vm793_vm13 = vcmp.eq.s32.totalorder %v2144_v47, %v2259_v2  ;;  %v2590_v31 = vld [vmem:[#allocation24_spill] sm:$0xff] }
 0x1cd   : > { %1529 = vmatpush.msk.msra.mxu3 %vm816_vm14, %v1135_v21  ;;  %vm782_vm14 = vcmp.eq.s32.totalorder %v2130_v23, %v2259_v2  ;;  %v2606_v21 = vld [vmem:[#allocation10_spill] sm:$0xff] }
 0x1ce   : > { %1495 = vmatpush.msk.msra.mxu0 %vm754_vm15, %v2238_v55  ;;  %vm812_vm15 = vcmp.eq.s32.totalorder %v2220_v59, %v2259_v2  ;;  %v2583_v59 = vld [vmem:[#allocation37_spill] sm:$0xff]  ;;  %v2588_v55 = vld [vmem:[#allocation42_spill] sm:$0xff] }
 0x1d0   : > { %1496 = vmatpush.msk.msra.mxu0 %vm753_vm0, %v2216_v40  ;;  %vm781_vm0 = vcmp.eq.s32.totalorder %v2108_v50, %v2259_v2  ;;  %v2582_v40 = vld [vmem:[#allocation29_spill] sm:$0xff] }
 0x1d1   : > { %1221 = vmatmul.f32.vlgmr.msra.gmra.mxu0 %v1997_v11 }
 0x1d2   : > { %v1035_v6 = vpop.permute.xlu2 %1034 }
 0x1d3   : > { %v1055_v24 = vpop.permute.xlu1 %1054 }
 0x1d4   : > { %v1130_v5 = vpop.permute.xlu0 %1129  ;;  %1513 = vmatpush.msk.msra.mxu2 %vm800_vm1, %v1055_v24  ;;  %vm811_vm1 = vcmp.eq.s32.totalorder %v2198_v61, %v2259_v2  ;;  %v2580_v61 = vld [vmem:[#allocation23_spill] sm:$0xff] }
 0x1d5   : > { %1530 = vmatpush.msk.msra.mxu3 %vm815_vm2, %v1130_v5  ;;  %vm780_vm2 = vcmp.eq.s32.totalorder %v2137_v36, %v2259_v2  ;;  %v2608_v24 = vld [vmem:[#allocation39_spill] sm:$0xff] }
 0x1d6   : > { %1514 = vmatpush.msk.msra.mxu2 %vm799_vm3, %v1050_v33  ;;  %vm810_vm3 = vcmp.eq.s32.totalorder %v2227_v63, %v2259_v2  ;;  %v2585_v63 = vld [vmem:[#allocation33_spill] sm:$0xff] }
 0x1d8   : > { %1515 = vmatpush.msk.msra.mxu2 %vm798_vm4, %v1045_v3  ;;  %vm809_vm4 = vcmp.eq.s32.totalorder %v2211_v13, %v2259_v2  ;;  %v2603_v3 = vld [vmem:[#allocation17_spill] sm:$0xff] }
 0x1d9   : > { %1224 = vmatmul.f32.gmra.mxu0 %v2014_v29 }
 0x1da   : > { %v1030_v60 = vpop.permute.xlu2 %1029  ;;  %1516 = vmatpush.msk.msra.mxu2 %vm797_vm5, %v1040_v48  ;;  %vm779_vm5 = vcmp.eq.s32.totalorder %v2576_v42, %v2259_v2  ;;  %v2605_v48 = vld [vmem:[#allocation34_spill] sm:$0xff] }
 0x1db   : > { %v975_v11 = vpop.permute.xlu1 %974 }
 0x1dc   : > { %v1125_v4 = vpop.permute.xlu0 %1124  ;;  %1497 = vmatpush.msk.msra.mxu1 %vm784_vm7, %v975_v11  ;;  %1517 = vmatpush.msk.msra.mxu2 %vm796_vm6, %v1035_v6  ;;  %vm778_vm6 = vcmp.eq.s32.totalorder %v2577_v41, %v2259_v2  ;;  %vm777_vm7 = vcmp.eq.s32.totalorder %v2578_v8, %v2259_v2  ;;  %v2607_v6 = vld [vmem:[#allocation15_spill] sm:$0xff]  ;;  %v1201_v41 = vld [vmem:[%s1933_s14] sm:$0xff] }
 0x1dd   : > { %1531 = vmatpush.msk.msra.mxu3 %vm814_vm8, %v1125_v4  ;;  %vm776_vm8 = vcmp.eq.s32.totalorder %v2579_v0, %v2259_v2  ;;  %v2610_v4 = vld [vmem:[#allocation13_spill] sm:$0xff] }
 0x1de   : > { %1518 = vmatpush.msk.msra.mxu2 %vm795_vm9, %v1030_v60  ;;  %vm775_vm9 = vcmp.eq.s32.totalorder %v2580_v61, %v2259_v2  ;;  %v2609_v60 = vld [vmem:[#allocation44_spill] sm:$0xff] }
 0x1e1   : > { %1227 = vmatmul.f32.gmra.mxu0 %v2041_v58 }
 0x1e2   : > { %v1025_v29 = vpop.permute.xlu2 %1024 }
 0x1e3   : > { %v970_v15 = vpop.permute.xlu1 %969  ;;  %1519 = vmatpush.msk.msra.mxu2 %vm794_vm10, %v1025_v29  ;;  %vm792_vm10 = vcmp.eq.s32.totalorder %v2581_v26, %v2259_v2  ;;  %v2611_v29 = vld [vmem:[#allocation11_spill] sm:$0xff] }
 0x1e4   : > { %v1120_v43 = vpop.permute.xlu0 %1119  ;;  %1498 = vmatpush.msk.msra.mxu1 %vm783_vm11, %v970_v15  ;;  %vm774_vm11 = vcmp.eq.s32.totalorder %v2582_v40, %v2259_v2  ;;  %v2612_v15 = vld [vmem:[#allocation18_spill] sm:$0xff] }
 0x1e5   : > { %1532 = vmatpush.msk.msra.mxu3 %vm813_vm12, %v1120_v43  ;;  %vm791_vm12 = vcmp.eq.s32.totalorder %v2583_v59, %v2259_v2  ;;  %v2613_v43 = vld [vmem:[#allocation14_spill] sm:$0xff] }
 0x1e9   : > { %1230 = vmatmul.f32.gmra.mxu0 %v2035_v54 }
 0x1ea   : > { %v1020_v58 = vpop.permute.xlu2 %1019 }
 0x1eb   : > { %v965_v1 = vpop.permute.xlu1 %964  ;;  %1520 = vmatpush.msk.msra.mxu2 %vm793_vm13, %v1020_v58  ;;  %vm773_vm13 = vcmp.eq.s32.totalorder %v2584_v32, %v2259_v2  ;;  %v2614_v58 = vld [vmem:[#allocation16_spill] sm:$0xff] }
 0x1ec   : > { %v1115_v49 = vpop.permute.xlu0 %1114  ;;  %1499 = vmatpush.msk.msra.mxu1 %vm782_vm14, %v965_v1  ;;  %vm790_vm14 = vcmp.eq.s32.totalorder %v2585_v63, %v2259_v2  ;;  %v2615_v1 = vld [vmem:[#allocation19_spill] sm:$0xff] }
 0x1ed   : > { %1533 = vmatpush.msk.msra.mxu3 %vm812_vm15, %v1115_v49  ;;  %vm772_vm15 = vcmp.eq.s32.totalorder %v2586_v30, %v2259_v2  ;;  %v2616_v49 = vld [vmem:[#allocation20_spill] sm:$0xff] }
 0x1f2   : > { %v1100_v50 = vpop.permute.xlu2 %1099 }
 0x1f3   : > { %v960_v9 = vpop.permute.xlu1 %959 }
 0x1f4   : > { %v1110_v54 = vpop.permute.xlu0 %1109  ;;  %1500 = vmatpush.msk.msra.mxu1 %vm781_vm0, %v960_v9  ;;  %vm771_vm0 = vcmp.eq.s32.totalorder %v2587_v18, %v2259_v2 }
 0x1f5   : > { %1534 = vmatpush.msk.msra.mxu3 %vm811_vm1, %v1110_v54  ;;  %vm808_vm1 = vcmp.eq.s32.totalorder %v2588_v55, %v2259_v2  ;;  %v1203_v55 = vld [vmem:[%s1933_s14 + $0x10] sm:$0xff] }
 0x1fa   : > { %v1005_v56 = vpop.permute.xlu2 %1004 }
 0x1fb   : > { %v955_v23 = vpop.permute.xlu1 %954 }
 0x1fc   : > { %v1105_v47 = vpop.permute.xlu0 %1104  ;;  %1501 = vmatpush.msk.msra.mxu1 %vm780_vm2, %v955_v23  ;;  %vm770_vm2 = vcmp.eq.s32.totalorder %v2590_v31, %v2259_v2 }
 0x1fd   : > { %1535 = vmatpush.msk.msra.mxu3 %vm810_vm3, %v1105_v47  ;;  %vm807_vm3 = vcmp.eq.s32.totalorder %v2591_v17, %v2259_v2 }
 0x1ff   : > { %1536 = vmatpush.msk.msra.mxu3 %vm809_vm4, %v1100_v50  ;;  %vm769_vm4 = vcmp.eq.s32.totalorder %v2592_v51, %v2259_v2 }
 0x202   : > { %v1085_v53 = vpop.permute.xlu2 %1084 }
 0x203   : > { %v950_v57 = vpop.permute.xlu1 %949 }
 0x204   : > { %1502 = vmatpush.msk.msra.mxu1 %vm779_vm5, %v950_v57  ;;  %v1010_v36 = vpop.permute.xlu0 %1009  ;;  %vm806_vm5 = vcmp.eq.s32.totalorder %v2593_v62, %v2259_v2 }
 0x206   : > { %1503 = vmatpush.msk.msra.mxu1 %vm778_vm6, %v2314_v28 }
 0x208   : > { %1504 = vmatpush.msk.msra.mxu1 %vm777_vm7, %v2280_v45  ;;  %v2594_v45 = vld [vmem:[#allocation49_spill] sm:$0xff]  ;;  %vm788_vm7 = vcmp.eq.s32.totalorder %v2597_v37, %v2259_v2 }
 0x20a   : > { %1505 = vmatpush.msk.msra.mxu1 %vm776_vm8, %v2328_v16  ;;  %v990_v52 = vpop.permute.xlu2 %989  ;;  %vm787_vm8 = vcmp.eq.s32.totalorder %v2598_v19, %v2259_v2 }
 0x20b   : > { %v1015_v13 = vpop.permute.xlu1 %1014 }
 0x20c   : > { %1506 = vmatpush.msk.msra.mxu1 %vm775_vm9, %v2298_v7  ;;  %1521 = vmatpush.msk.msra.mxu2 %vm792_vm10, %v1015_v13  ;;  %v1090_v14 = vpop.permute.xlu0 %1089  ;;  %vm805_vm9 = vcmp.eq.s32.totalorder %v2600_v44, %v2259_v2  ;;  %v2601_v7 = vld [vmem:[#allocation46_spill] sm:$0xff] }
 0x20d   : > { %vm804_vm10 = vcmp.eq.s32.totalorder %v2601_v7, %v2259_v2  ;;  %v1202_v13 = vld [vmem:[%s1933_s14 + $0x8] sm:$0xff] }
 0x20e   : > { %1507 = vmatpush.msk.msra.mxu1 %vm774_vm11, %v2273_v39  ;;  %1522 = vmatpush.msk.msra.mxu2 %vm791_vm12, %v1010_v36  ;;  %v2596_v39 = vld [vmem:[#allocation38_spill] sm:$0xff]  ;;  %vm803_vm11 = vcmp.eq.s32.totalorder %v2602_v38, %v2259_v2 }
 0x20f   : > { %vm789_vm6 = vcmp.eq.s32.totalorder %v2596_v39, %v2259_v2 }
 0x210   : > { %1508 = vmatpush.msk.msra.mxu1 %vm773_vm13, %v2312_v22  ;;  %1523 = vmatpush.msk.msra.mxu2 %vm790_vm14, %v1005_v56  ;;  %v2604_v22 = vld [vmem:[#allocation36_spill] sm:$0xff]  ;;  %vm785_vm13 = vcmp.eq.s32.totalorder %v2605_v48, %v2259_v2  ;;  %vm802_vm14 = vcmp.eq.s32.totalorder %v2608_v24, %v2259_v2 }
 0x211   : > { %vm786_vm12 = vcmp.eq.s32.totalorder %v2604_v22, %v2259_v2 }
 0x212   : > { %1509 = vmatpush.msk.msra.mxu1 %vm772_vm15, %v2284_v20  ;;  %v2599_v20 = vld [vmem:[#allocation12_spill] sm:$0xff]  ;;  %v1070_v27 = vpop.permute.xlu2 %1069  ;;  %vm801_vm15 = vcmp.eq.s32.totalorder %v2609_v60, %v2259_v2 }
 0x213   : > { %v1095_v46 = vpop.permute.xlu1 %1094 }
 0x214   : > { %1510 = vmatpush.msk.msra.mxu1 %vm771_vm0, %v2589_v12  ;;  %1537 = vmatpush.msk.msra.mxu3 %vm808_vm1, %v1095_v46  ;;  %v995_v35 = vpop.permute.xlu0 %994 }
 0x216   : > { %1511 = vmatpush.msk.msra.mxu1 %vm770_vm2, %v2296_v10  ;;  %1538 = vmatpush.msk.msra.mxu3 %vm807_vm3, %v1090_v14 }
 0x218   : > { %1512 = vmatpush.msk.msra.mxu1 %vm769_vm4, %v2594_v45  ;;  %1539 = vmatpush.msk.msra.mxu3 %vm806_vm5, %v1085_v53 }
 0x219   : > { %1250 = vmatmul.f32.vlgmr.msra.gmra.mxu1 %v2595_v25 }
 0x21a   : > { %v1060_v11 = vpop.permute.xlu2 %1059 }
 0x21b   : > { %v1000_v34 = vpop.permute.xlu1 %999 }
 0x21c   : > { %1524 = vmatpush.msk.msra.mxu2 %vm789_vm6, %v1000_v34  ;;  %v1075_v33 = vpop.permute.xlu0 %1074 }
 0x21e   : > { %1525 = vmatpush.msk.msra.mxu2 %vm788_vm7, %v995_v35  ;;  %v1204_v35 = vld [vmem:[%s1933_s14 + $0x18] sm:$0xff] }
 0x220   : > { %1526 = vmatpush.msk.msra.mxu2 %vm787_vm8, %v990_v52 }
 0x221   : > { %1253 = vmatmul.f32.gmra.mxu1 %v2599_v20 }
 0x223   : > { %v1080_v10 = vpop.permute.xlu1 %1079 }
 0x224   : > { %1540 = vmatpush.msk.msra.mxu3 %vm805_vm9, %v1080_v10  ;;  %v980_v16 = vpop.permute.xlu0 %979 }
 0x226   : > { %1541 = vmatpush.msk.msra.mxu3 %vm804_vm10, %v1075_v33 }
 0x228   : > { %1542 = vmatpush.msk.msra.mxu3 %vm803_vm11, %v1070_v27 }
 0x229   : > { %1256 = vmatmul.f32.gmra.mxu1 %v2603_v3 }
 0x22b   : > { %v985_v28 = vpop.permute.xlu1 %984 }
 0x22c   : > { %1527 = vmatpush.msk.msra.mxu2 %vm786_vm12, %v985_v28 }
 0x22e   : > { %1528 = vmatpush.msk.msra.mxu2 %vm785_vm13, %v980_v16 }
 0x22f   : > { %1279 = vmatmul.f32.vlgmr.msra.gmra.mxu2 %v2606_v21 }
 0x231   : > { %1259 = vmatmul.f32.gmra.mxu1 %v2607_v6 }
 0x233   : > { %v1065_v5 = vpop.permute.xlu1 %1064 }
 0x234   : > { %1543 = vmatpush.msk.msra.mxu3 %vm802_vm14, %v1065_v5 }
 0x236   : > { %1544 = vmatpush.msk.msra.mxu3 %vm801_vm15, %v1060_v11 }
 0x237   : > { %1282 = vmatmul.f32.gmra.mxu2 %v2610_v4  ;;  %1308 = vmatmul.f32.vlgmr.msra.gmra.mxu3 %v2611_v29 }
 0x23f   : > { %1285 = vmatmul.f32.gmra.mxu2 %v2612_v15  ;;  %1311 = vmatmul.f32.gmra.mxu3 %v2613_v43 }
 0x247   : > { %1288 = vmatmul.f32.gmra.mxu2 %v2614_v58  ;;  %1314 = vmatmul.f32.gmra.mxu3 %v2615_v1 }
 0x24e   : > { %v1222_v2 = vpop.f32.mrf.mxu0 }
 0x24f   : > { %1317 = vmatmul.f32.gmra.mxu3 %v2616_v49 }
 0x256   : > { %v1225_v50 = vpop.f32.mrf.mxu0 }
 0x25e   : > { %v1228_v32 = vpop.f32.mrf.mxu0 }
 0x266   : > { %v1231_v17 = vpop.f32.mrf.mxu0 }
 0x296   : > { %v1251_v9 = vpop.f32.mrf.mxu1 }
 0x297   : > { %v1252_v23 = vadd.f32 %v1251_v9, %v1222_v2 }
 0x29e   : > { %v1254_v47 = vpop.f32.mrf.mxu1 }
 0x29f   : > { %v1255_v56 = vadd.f32 %v1254_v47, %v1225_v50 }
 0x2a6   : > { %v1257_v26 = vpop.f32.mrf.mxu1 }
 0x2a7   : > { %v1258_v30 = vadd.f32 %v1257_v26, %v1228_v32 }
 0x2ae   : > { %v1260_v12 = vpop.f32.mrf.mxu1 }
 0x2af   : > { %v1261_v62 = vadd.f32 %v1260_v12, %v1231_v17 }
 0x2b2   : > { %v1280_v54 = vpop.f32.mrf.mxu2 }
 0x2b3   : > { %v1281_v42 = vadd.f32 %v1280_v54, %v1252_v23 }
 0x2ba   : > { %v1283_v57 = vpop.f32.mrf.mxu2  ;;  %v1309_v36 = vpop.f32.mrf.mxu3 }
 0x2bb   : > { %v1310_v8 = vadd.f32 %v1309_v36, %v1281_v42  ;;  %v1284_v61 = vadd.f32 %v1283_v57, %v1255_v56 }
 0x2bd   : > { %v1321_v0 = vadd.f32 %v1310_v8, %v1201_v41 }
 0x2bf   : > { %1325 = vst [vmem:[%s1933_s14] sm:$0xff] %v1321_v0 }
 0x2c2   : > { %v1312_v40 = vpop.f32.mrf.mxu3  ;;  %v1286_v63 = vpop.f32.mrf.mxu2 }
 0x2c3   : > { %v1313_v59 = vadd.f32 %v1312_v40, %v1284_v61  ;;  %v1287_v18 = vadd.f32 %v1286_v63, %v1258_v30 }
 0x2c5   : > { %v1322_v14 = vadd.f32 %v1313_v59, %v1202_v13 }
 0x2c7   : > { %1326 = vst [vmem:[%s1933_s14 + $0x8] sm:$0xff] %v1322_v14 }
 0x2ca   : > { %v1315_v53 = vpop.f32.mrf.mxu3  ;;  %v1289_v51 = vpop.f32.mrf.mxu2 }
 0x2cb   : > { %v1316_v46 = vadd.f32 %v1315_v53, %v1287_v18  ;;  %v1290_v45 = vadd.f32 %v1289_v51, %v1261_v62 }
 0x2cd   : > { %v1323_v31 = vadd.f32 %v1316_v46, %v1203_v55 }
 0x2cf   : > { %1327 = vst [vmem:[%s1933_s14 + $0x10] sm:$0xff] %v1323_v31 }
 0x2d2   : > { %v1318_v25 = vpop.f32.mrf.mxu3 }
 0x2d3   : > { %v1319_v39 = vadd.f32 %v1318_v25, %v1290_v45 }
 0x2d5   : > { %v1324_v34 = vadd.f32 %v1319_v39, %v1204_v35 }
 0x2d7   : > { %1328 = vst [vmem:[%s1933_s14 + $0x18] sm:$0xff] %v1324_v34 }
 0x2d8   : > { %1679 = shalt.err (!%p1676_p0)
}
 0x2d9   : > { %s1768_s14 = smov 128   ;;  %s1769_s8 = smov 8  }
 0x2da   : > { %1551 = dma.vmem_to_hbm [thread:$0]  (%p1867_p7), %s1343_s5, 512, %s1345_s18, %s1330_s13, %s1768_s14, %s1768_s14, %s1769_s8  }
 0x2db PF: > { %p1557_p1 = scmp.ge.s32.totalorder %s1762_s24, 2  ;;  %s1359_s28 = sand.u32 1, %s1726_s15  }
 0x2dc   : > { %s1360_s9 = scalar_lea.sflag [#allocation4], %s1359_s28 }
 0x2dd   : > { %p1554_p2 = pnand %p1557_p1, %p1875_p12 }
 0x2df   : > { %p1555_p3 = pneg %p1554_p2 }
 0x2e1   : > { %1721 = dma.done.wait (%p1555_p3), %s1360_s9, 512  }
 0x2e2   : > { %1723 = vsyncadd (%p1555_p3), %s1360_s9, 4294966784  ;;  %s17_s24 = sadd.s32 1, %s1762_s24   ;;  %s2618_s21 = sld [smem:[#allocation6_spill]] }
 0x2e3   : > { %p14_p4 = scmp.ge.s32.totalorder %s17_s24, 6   ;;  %s2619_s7 = sld [smem:[#allocation7_spill]] }
 0x2e4   : > { %s2620_s23 = sld [smem:[#allocation8_spill]]  ;;  %s2621_s15 = smov %s1730_s16 }
 0x2e5   : > { %s2622_s16 = smov %s1734_s17  ;;  %s2623_s17 = smov %s1880_s11 }
 0x2e6   : > { %s2624_s18 = smov %s1742_s19  ;;  %s2625_s19 = smov %s1883_s12 }
 0x2e7   : > { %s2626_s20 = smov %s1754_s22  ;;  %16 = sbr.rel (!%p14_p4) target bundleno = 8 (0x8), region = 109 }
 0x2e9   : > { %s2627_s22 = smov %s2619_s7 }
 0x2ec   :  { %1366 = vsyncpa [#allocation4], 1 }
 0x2ed   :  { %1368 = vsyncpa [#allocation4 + $0x1], 1 }

</bundles_post_ra>
